<compile_context>
chip_gen: v7x
topology: tpu7x:2x2x1
jax: 0.10.0
libtpu: 0.0.40
codegen_flags: <defaults>
</compile_context>

<pallas_src>
import math
import numpy as np
import jax
import jax.numpy as jnp
from jax import lax
from jax.experimental import pallas as pl
from jax.experimental.pallas import tpu as pltpu


def _round_up(x, m):
    return -(-x // m) * m


# ----------------------------------- kernel -------------------------------------------

def gru_pool_mlp_kernel(gir_ref, giz_ref, gin_ref, start_ref, end_ref,
                        wh_ref, bhn_ref, w1_ref, b1_ref, w2_ref, b2_ref,
                        out_ref, h_ref, pooled_ref):
    """Fused bidirectional 3-stream GRU recurrence + valid-max-pool + MLP head.

    grid = (batch tiles [parallel], time tiles [arbitrary, serial carry])

    gi*_ref   : [TT, Bt, W] bf16  precomputed input-side gate pre-activations
    start/end : [Bt, W] int32     valid iff start <= global_step < end
    wh_ref    : [W, 3W] bf16      fused block-diagonal recurrent weight (r|z|n)
    bhn_ref   : [1, W]  f32       hidden bias of the n gate
    w1/b1/w2/b2                   lane-padded MLP head
    out_ref   : [Bt, Lp] f32
    h_ref, pooled_ref : [Bt, W] f32 scratch accumulators (persist across t)
    """
    TT, Bt, W = gir_ref.shape
    t_blk = pl.program_id(1)

    @pl.when(t_blk == 0)
    def _():
        h_ref[...] = jnp.zeros((Bt, W), jnp.float32)
        # Finite "-inf": pad lanes / never-valid rows must not create NaN/Inf
        # when multiplied by the (zero-padded) head weights.
        pooled_ref[...] = jnp.full((Bt, W), -1e30, jnp.float32)

    # Hoist loop invariants (weights, biases, validity tables) out of the loop.
    wh = wh_ref[...]                                          # [W, 3W] bf16
    bhn = jnp.broadcast_to(bhn_ref[...], (Bt, W))             # [Bt, W] f32
    start = start_ref[...]                                    # [Bt, W] int32
    end = end_ref[...]
    t0 = t_blk * TT

    def step(i, carry):
        h, pooled = carry
        gir = gir_ref[i].astype(jnp.float32)                  # [Bt, W]
        giz = giz_ref[i].astype(jnp.float32)
        gin = gin_ref[i].astype(jnp.float32)
        valid = ((t0 + i) >= start) & ((t0 + i) < end)        # VPU compare, no mask stream

        # Single fused h-dependent matmul per step (one MXU push / drain).
        gh = jnp.dot(h.astype(jnp.bfloat16), wh,
                     preferred_element_type=jnp.float32)      # [Bt, 3W]
        r = jax.nn.sigmoid(gir + gh[:, 0:W])
        z = jax.nn.sigmoid(giz + gh[:, W:2 * W])
        n = jnp.tanh(gin + r * (gh[:, 2 * W:3 * W] + bhn))
        h_new = (1.0 - z) * n + z * h

        h = jnp.where(valid, h_new, h)
        pooled = jnp.where(valid, jnp.maximum(pooled, h_new), pooled)
        return h, pooled

    h, pooled = lax.fori_loop(0, TT, step, (h_ref[...], pooled_ref[...]),
                              unroll=True)
    h_ref[...] = h
    pooled_ref[...] = pooled

    @pl.when(t_blk == pl.num_programs(1) - 1)
    def _():
        # pooled == concat(pre_f, pre_b, post_f, post_b, level_f, level_b) (+ zero pad).
        h1 = jnp.maximum(
            jnp.dot(pooled.astype(jnp.bfloat16), w1_ref[...],
                    preferred_element_type=jnp.float32) + b1_ref[...],
            0.0)
        out_ref[...] = jnp.dot(h1.astype(jnp.bfloat16), w2_ref[...],
                               preferred_element_type=jnp.float32) + b2_ref[...]


# ------------------------------- wrapper / XLA glue ------------------------------------

def rnn_model_forward(params, padded_inputs, lengths_list, *, time_tile=4):
    """padded_inputs: list of 3 int32 arrays [B, T_s]; lengths_list: list of [B,1] int32."""
    emb = params["embedding"]
    H = params["pre"]["wh_f"].shape[0]
    Hh = params["head"]["w1"].shape[1]                 # 2H
    L = params["head"]["w2"].shape[1]
    B = int(padded_inputs[0].shape[0])
    T = max(int(p.shape[1]) for p in padded_inputs)

    TT = time_tile
    Tp = _round_up(T, TT)
    W = _round_up(6 * H, 128)                          # 192 -> 256 lane pad
    HLp = _round_up(Hh, 128)                           # head hidden lane pad
    Lp = _round_up(L, 128)                             # output lane pad

    if B <= 128:
        Bt = max(8, _round_up(B, 8))
        Bp = Bt
    else:
        Bt = 128
        Bp = _round_up(B, 128)

    gi_r, gi_z, gi_n = [], [], []
    start_cols, end_cols = [], []
    whr_blk, whz_blk, whn_blk, bhn_blk = [], [], [], []

    # Group order g = (pre,f),(pre,b),(post,f),(post,b),(level,f),(level,b)
    # == the PyTorch feature concat order, so pooled needs no shuffle.
    for s, name in enumerate(("pre", "post", "level")):
        idx = padded_inputs[s].astype(jnp.int32)
        Ts = int(idx.shape[1])
        idx = jnp.pad(idx, ((0, 0), (0, Tp - Ts)))                 # pad to global Tp
        lens = lengths_list[s].reshape(-1).astype(jnp.int32)
        lens = jnp.pad(lens, (0, Bp - B))                          # pad rows -> length 0
        embs = emb[idx].astype(jnp.float32)                        # [B, Tp, E] (gather = glue)
        embs = jnp.transpose(embs, (1, 0, 2))                      # [Tp, B, E]
        embs = jnp.pad(embs, ((0, 0), (0, Bp - B), (0, 0)))        # [Tp, Bp, E]
        p = params[name]
        for d, sfx in enumerate(("f", "b")):
            wi, wh = p["wi_" + sfx], p["wh_" + sfx]                # [E,3H], [H,3H] (r,z,n)
            bi, bh = p["bi_" + sfx], p["bh_" + sfx]                # [1,3H]
            x = embs[::-1] if d == 1 else embs                     # pre-reverse time for bwd
            gi = jnp.einsum("tbe,eh->tbh", x, wi) + bi             # hoisted input projection
            gi_r.append(gi[..., 0:H] + bh[:, 0:H])                 # fold commuting biases
            gi_z.append(gi[..., H:2 * H] + bh[:, H:2 * H])
            gi_n.append(gi[..., 2 * H:3 * H])                      # bh_n must stay with gh_n
            whr_blk.append(wh[:, 0:H])
            whz_blk.append(wh[:, H:2 * H])
            whn_blk.append(wh[:, 2 * H:3 * H])
            bhn_blk.append(bh[:, 2 * H:3 * H])
            if d == 0:                                             # fwd: valid i in [0, len)
                st, en = jnp.zeros_like(lens), lens
            else:                                                  # bwd (reversed): [Tp-len, Tp)
                st, en = Tp - lens, jnp.full_like(lens, Tp)
            start_cols.append(jnp.broadcast_to(st[:, None], (Bp, H)))
            end_cols.append(jnp.broadcast_to(en[:, None], (Bp, H)))

    def pad_lanes(x, w):
        return jnp.pad(x, [(0, 0)] * (x.ndim - 1) + [(0, w - x.shape[-1])])

    gir = pad_lanes(jnp.concatenate(gi_r, -1), W).astype(jnp.bfloat16)   # [Tp, Bp, W]
    giz = pad_lanes(jnp.concatenate(gi_z, -1), W).astype(jnp.bfloat16)
    gin = pad_lanes(jnp.concatenate(gi_n, -1), W).astype(jnp.bfloat16)
    start = pad_lanes(jnp.concatenate(start_cols, -1), W).astype(jnp.int32)  # pad lanes: 0
    end = pad_lanes(jnp.concatenate(end_cols, -1), W).astype(jnp.int32)      # pad lanes: 0 -> never valid

    def block_diag_padded(blocks, w):
        out = jnp.zeros((w, w), jnp.float32)
        for g, blk in enumerate(blocks):
            r, c = blk.shape
            out = out.at[g * r:(g + 1) * r, g * c:(g + 1) * c].set(blk)
        return out

    wh_fused = jnp.concatenate(
        [block_diag_padded(whr_blk, W),
         block_diag_padded(whz_blk, W),
         block_diag_padded(whn_blk, W)], axis=1).astype(jnp.bfloat16)    # [W, 3W]
    bhn = pad_lanes(jnp.concatenate(bhn_blk, -1), W).astype(jnp.float32)  # [1, W]

    head = params["head"]
    w1 = jnp.zeros((W, HLp), jnp.float32).at[:6 * H, :Hh].set(head["w1"]).astype(jnp.bfloat16)
    b1 = jnp.zeros((1, HLp), jnp.float32).at[:, :Hh].set(head["b1"])
    w2 = jnp.zeros((HLp, Lp), jnp.float32).at[:Hh, :L].set(head["w2"]).astype(jnp.bfloat16)
    b2 = jnp.zeros((1, Lp), jnp.float32).at[:, :L].set(head["b2"])

    nb, nt = Bp // Bt, Tp // TT
    TW = 3 * W

    out = pl.pallas_call(
        gru_pool_mlp_kernel,
        out_shape=jax.ShapeDtypeStruct((Bp, Lp), jnp.float32),
        grid_spec=pltpu.PrefetchScalarGridSpec(
            num_scalar_prefetch=0,
            grid=(nb, nt),
            in_specs=[
                pl.BlockSpec((TT, Bt, W), lambda b, t: (t, b, 0)),   # gir
                pl.BlockSpec((TT, Bt, W), lambda b, t: (t, b, 0)),   # giz
                pl.BlockSpec((TT, Bt, W), lambda b, t: (t, b, 0)),   # gin
                pl.BlockSpec((Bt, W), lambda b, t: (b, 0)),          # start
                pl.BlockSpec((Bt, W), lambda b, t: (b, 0)),          # end
                pl.BlockSpec((W, TW), lambda b, t: (0, 0)),          # wh fused (resident)
                pl.BlockSpec((1, W), lambda b, t: (0, 0)),           # bhn
                pl.BlockSpec((W, HLp), lambda b, t: (0, 0)),         # w1
                pl.BlockSpec((1, HLp), lambda b, t: (0, 0)),         # b1
                pl.BlockSpec((HLp, Lp), lambda b, t: (0, 0)),        # w2
                pl.BlockSpec((1, Lp), lambda b, t: (0, 0)),          # b2
            ],
            out_specs=pl.BlockSpec((Bt, Lp), lambda b, t: (b, 0)),
            scratch_shapes=[pltpu.VMEM((Bt, W), jnp.float32),        # h
                            pltpu.VMEM((Bt, W), jnp.float32)],       # pooled
        ),
        compiler_params=pltpu.CompilerParams(
            dimension_semantics=("parallel", "arbitrary")),
    )(gir, giz, gin, start, end, wh_fused, bhn, w1, b1, w2, b2)
    return out[:B, :L]                                   # drop sublane/lane padding


# ------------------------- pure-JAX reference (for self-check) ------------------------

def _ref_gru_pool(embs_tbe, lens, p):
    T, B, _E = embs_tbe.shape
    H = p["wh_f"].shape[0]

    def run(wi, wh, bi, bh, reverse):
        h = jnp.zeros((B, H), jnp.float32)
        pooled = jnp.full((B, H), -jnp.inf, jnp.float32)
        order = range(T - 1, -1, -1) if reverse else range(T)
        for t in order:
            x = embs_tbe[t]
            gi = x @ wi + bi
            gh = h @ wh + bh
            r = jax.nn.sigmoid(gi[:, :H] + gh[:, :H])
            z = jax.nn.sigmoid(gi[:, H:2 * H] + gh[:, H:2 * H])
            n = jnp.tanh(gi[:, 2 * H:] + r * gh[:, 2 * H:])
            h_new = (1.0 - z) * n + z * h
            valid = lens > t
            h = jnp.where(valid, h_new, h)
            pooled = jnp.where(valid, jnp.maximum(pooled, h_new), pooled)
        return pooled

    return jnp.concatenate(
        [run(p["wi_f"], p["wh_f"], p["bi_f"], p["bh_f"], False),
         run(p["wi_b"], p["wh_b"], p["bi_b"], p["bh_b"], True)], axis=-1)


def _ref_forward(params, padded_inputs, lengths_list):
    pooled = []
    for name, idx, lens in zip(("pre", "post", "level"), padded_inputs, lengths_list):
        embs = params["embedding"][idx]
        embs_tbe = jnp.transpose(embs, (1, 0, 2)).astype(jnp.float32)
        pooled.append(_ref_gru_pool(embs_tbe, lens, params[name]))
    feats = jnp.concatenate(pooled, axis=-1)
    h = jnp.maximum(feats @ params["head"]["w1"] + params["head"]["b1"], 0.0)
    return h @ params["head"]["w2"] + params["head"]["b2"]


# ------------------------------ parameter construction --------------------------------

def _uniform(key, shape, scale):
    return jax.random.uniform(key, shape, jnp.float32, -scale, scale)


def init_params(key, vocab_size, label_size, emb_dim, rnn_state_dim):
    H, E = rnn_state_dim, emb_dim
    sc = 1.0 / math.sqrt(H)
    keys = jax.random.split(key, 32)
    ki = iter(keys)

    params = {"embedding": jax.random.normal(next(ki), (vocab_size, E), jnp.float32)}
    for name in ("pre", "post", "level"):
        params[name] = {
            "wi_f": _uniform(next(ki), (E, 3 * H), sc),
            "wh_f": _uniform(next(ki), (H, 3 * H), sc),
            "bi_f": _uniform(next(ki), (1, 3 * H), sc),
            "bh_f": _uniform(next(ki), (1, 3 * H), sc),
            "wi_b": _uniform(next(ki), (E, 3 * H), sc),
            "wh_b": _uniform(next(ki), (H, 3 * H), sc),
            "bi_b": _uniform(next(ki), (1, 3 * H), sc),
            "bh_b": _uniform(next(ki), (1, 3 * H), sc),
        }
    sc1 = 1.0 / math.sqrt(6 * H)
    sc2 = 1.0 / math.sqrt(2 * H)
    params["head"] = {
        "w1": _uniform(next(ki), (6 * H, 2 * H), sc1),
        "b1": _uniform(next(ki), (1, 2 * H), sc1),
        "w2": _uniform(next(ki), (2 * H, label_size), sc2),
        "b2": _uniform(next(ki), (1, label_size), sc2),
    }
    return params


def pad_batch(seqs):
    """pad_sequence(batch_first=True, padding_value=0) + lengths."""
    B = len(seqs)
    T = max(int(s.shape[0]) for s in seqs)
    out = np.zeros((B, T), np.int32)
    for i, s in enumerate(seqs):
        out[i, : s.shape[0]] = np.asarray(s)
    lens = np.array([s.shape[0] for s in seqs], np.int32).reshape(B, 1)
    return jnp.asarray(out), jnp.asarray(lens)


if __name__ == "__main__":
    vocab_size, label_size, emb_dim, rnn_state_dim = 50, 5, 32, 32
    batch_size = 2

    key = jax.random.PRNGKey(0)
    pkey, dkey = jax.random.split(key)
    params = init_params(pkey, vocab_size, label_size, emb_dim, rnn_state_dim)

    # Variable-length token sequences (pre-order, post-order, level-order).
    dkeys = jax.random.split(dkey, 6)
    pre_seqs = [jax.random.randint(dkeys[0], (7,), 1, vocab_size, jnp.int32),
                jax.random.randint(dkeys[1], (5,), 1, vocab_size, jnp.int32)]
    post_seqs = [jax.random.randint(dkeys[2], (6,), 1, vocab_size, jnp.int32),
                 jax.random.randint(dkeys[3], (8,), 1, vocab_size, jnp.int32)]
    level_seqs = [jax.random.randint(dkeys[4], (4,), 1, vocab_size, jnp.int32),
                  jax.random.randint(dkeys[5], (3,), 1, vocab_size, jnp.int32)]

    padded_inputs, lengths_list = [], []
    for seqs in (pre_seqs, post_seqs, level_seqs):
        p, l = pad_batch(seqs)
        padded_inputs.append(p)
        lengths_list.append(l)

    out = rnn_model_forward(params, padded_inputs, lengths_list, time_tile=4)
    out = jax.block_until_ready(out)
    assert out.shape == (batch_size, label_size)
    assert np.all(np.isfinite(np.asarray(out)))

    ref = jax.block_until_ready(_ref_forward(params, padded_inputs, lengths_list))
    # bf16 MXU operands vs f32 reference -> slightly relaxed tolerance.
    np.testing.assert_allclose(np.asarray(out), np.asarray(ref), rtol=2e-2, atol=3e-2)

    print("KERNEL_OK")
</pallas_src>

<mosaic_0001>
module attributes {stable_mosaic.version = 11 : i64} {
  func.func @gru_pool_mlp_kernel(%arg0: i32, %arg1: i32, %arg2: memref<4x8x256xbf16, #tpu.memory_space<vmem>>, %arg3: memref<4x8x256xbf16, #tpu.memory_space<vmem>>, %arg4: memref<4x8x256xbf16, #tpu.memory_space<vmem>>, %arg5: memref<8x256xi32, #tpu.memory_space<vmem>>, %arg6: memref<8x256xi32, #tpu.memory_space<vmem>>, %arg7: memref<256x768xbf16, #tpu.memory_space<vmem>>, %arg8: memref<1x256xf32, #tpu.memory_space<vmem>>, %arg9: memref<256x128xbf16, #tpu.memory_space<vmem>>, %arg10: memref<1x128xf32, #tpu.memory_space<vmem>>, %arg11: memref<128x128xbf16, #tpu.memory_space<vmem>>, %arg12: memref<1x128xf32, #tpu.memory_space<vmem>>, %arg13: memref<8x128xf32, #tpu.memory_space<vmem>>, %arg14: memref<8x256xf32, #tpu.memory_space<vmem>>, %arg15: memref<8x256xf32, #tpu.memory_space<vmem>>) attributes {dimension_semantics = [#tpu.dimension_semantics<parallel>, #tpu.dimension_semantics<arbitrary>], iteration_bounds = array<i64: 1, 2>, scalar_prefetch = 0 : i64, scratch_operands = 2 : i64, tpu.core_type = #tpu.core_type<tc>, window_params = [{transform_indices = @transform_0, window_bounds = array<i64: 4, 8, 256>}, {transform_indices = @transform_1, window_bounds = array<i64: 4, 8, 256>}, {transform_indices = @transform_2, window_bounds = array<i64: 4, 8, 256>}, {transform_indices = @transform_3, window_bounds = array<i64: 8, 256>}, {transform_indices = @transform_4, window_bounds = array<i64: 8, 256>}, {pipeline_mode = #tpu.pipeline_mode<synchronous>, transform_indices = @transform_5, window_bounds = array<i64: 256, 768>}, {pipeline_mode = #tpu.pipeline_mode<synchronous>, transform_indices = @transform_6, window_bounds = array<i64: 1, 256>}, {pipeline_mode = #tpu.pipeline_mode<synchronous>, transform_indices = @transform_7, window_bounds = array<i64: 256, 128>}, {pipeline_mode = #tpu.pipeline_mode<synchronous>, transform_indices = @transform_8, window_bounds = array<i64: 1, 128>}, {pipeline_mode = #tpu.pipeline_mode<synchronous>, transform_indices = @transform_9, window_bounds = array<i64: 128, 128>}, {pipeline_mode = #tpu.pipeline_mode<synchronous>, transform_indices = @transform_10, window_bounds = array<i64: 1, 128>}, {transform_indices = @transform_11, window_bounds = array<i64: 8, 128>}]} {
    %c0_i32 = arith.constant 0 : i32
    %0 = arith.cmpi eq, %arg1, %c0_i32 : i32
    %1 = arith.extui %0 : i1 to i32
    %c0_i32_0 = arith.constant 0 : i32
    %2 = arith.cmpi ne, %1, %c0_i32_0 : i32
    scf.if %2 {
      %cst_59 = arith.constant 0.000000e+00 : f32
      %209 = vector.broadcast %cst_59 : f32 to vector<8x256xf32>
      %c0_60 = arith.constant 0 : index
      %c0_61 = arith.constant 0 : index
      %210 = vector.load %arg14[%c0_60, %c0_61] : memref<8x256xf32, #tpu.memory_space<vmem>>, vector<8x256xf32>
      tpu.vector_store %arg14[%c0_60, %c0_61], %209 {strides = array<i32>} : memref<8x256xf32, #tpu.memory_space<vmem>>, vector<8x256xf32>,
      %cst_62 = arith.constant -1.000000e+30 : f32
      %211 = vector.broadcast %cst_62 : f32 to vector<8x256xf32>
      %c0_63 = arith.constant 0 : index
      %c0_64 = arith.constant 0 : index
      %212 = vector.load %arg15[%c0_63, %c0_64] : memref<8x256xf32, #tpu.memory_space<vmem>>, vector<8x256xf32>
      tpu.vector_store %arg15[%c0_63, %c0_64], %211 {strides = array<i32>} : memref<8x256xf32, #tpu.memory_space<vmem>>, vector<8x256xf32>,
    } else {
    }
    %c0 = arith.constant 0 : index
    %c0_1 = arith.constant 0 : index
    %3 = vector.load %arg7[%c0, %c0_1] : memref<256x768xbf16, #tpu.memory_space<vmem>>, vector<256x768xbf16>
    %c0_2 = arith.constant 0 : index
    %c0_3 = arith.constant 0 : index
    %4 = vector.load %arg8[%c0_2, %c0_3] : memref<1x256xf32, #tpu.memory_space<vmem>>, vector<1x256xf32>
    %5 = vector.shape_cast %4 : vector<1x256xf32> to vector<1x256xf32>
    %6 = vector.broadcast %5 : vector<1x256xf32> to vector<8x256xf32>
    %c0_4 = arith.constant 0 : index
    %c0_5 = arith.constant 0 : index
    %7 = vector.load %arg5[%c0_4, %c0_5] : memref<8x256xi32, #tpu.memory_space<vmem>>, vector<8x256xi32>
    %c0_6 = arith.constant 0 : index
    %c0_7 = arith.constant 0 : index
    %8 = vector.load %arg6[%c0_6, %c0_7] : memref<8x256xi32, #tpu.memory_space<vmem>>, vector<8x256xi32>
    %c4_i32 = arith.constant 4 : i32
    %9 = arith.muli %arg1, %c4_i32 : i32
    %c0_8 = arith.constant 0 : index
    %c0_9 = arith.constant 0 : index
    %10 = vector.load %arg14[%c0_8, %c0_9] : memref<8x256xf32, #tpu.memory_space<vmem>>, vector<8x256xf32>
    %c0_10 = arith.constant 0 : index
    %c0_11 = arith.constant 0 : index
    %11 = vector.load %arg15[%c0_10, %c0_11] : memref<8x256xf32, #tpu.memory_space<vmem>>, vector<8x256xf32>
    %c0_i32_12 = arith.constant 0 : i32
    %12 = arith.index_cast %c0_i32_12 : i32 to index
    %c0_13 = arith.constant 0 : index
    %c0_14 = arith.constant 0 : index
    %13 = vector.load %arg2[%12, %c0_13, %c0_14] : memref<4x8x256xbf16, #tpu.memory_space<vmem>>, vector<1x8x256xbf16>
    %14 = vector.shape_cast %13 : vector<1x8x256xbf16> to vector<8x256xbf16>
    %15 = arith.extf %14 : vector<8x256xbf16> to vector<8x256xf32>
    %16 = arith.index_cast %c0_i32_12 : i32 to index
    %c0_15 = arith.constant 0 : index
    %c0_16 = arith.constant 0 : index
    %17 = vector.load %arg3[%16, %c0_15, %c0_16] : memref<4x8x256xbf16, #tpu.memory_space<vmem>>, vector<1x8x256xbf16>
    %18 = vector.shape_cast %17 : vector<1x8x256xbf16> to vector<8x256xbf16>
    %19 = arith.extf %18 : vector<8x256xbf16> to vector<8x256xf32>
    %20 = arith.index_cast %c0_i32_12 : i32 to index
    %c0_17 = arith.constant 0 : index
    %c0_18 = arith.constant 0 : index
    %21 = vector.load %arg4[%20, %c0_17, %c0_18] : memref<4x8x256xbf16, #tpu.memory_space<vmem>>, vector<1x8x256xbf16>
    %22 = vector.shape_cast %21 : vector<1x8x256xbf16> to vector<8x256xbf16>
    %23 = arith.extf %22 : vector<8x256xbf16> to vector<8x256xf32>
    %24 = arith.addi %9, %c0_i32_12 : i32
    %25 = vector.broadcast %24 : i32 to vector<8x256xi32>
    %26 = arith.cmpi sge, %25, %7 : vector<8x256xi32>
    %27 = arith.addi %9, %c0_i32_12 : i32
    %28 = vector.broadcast %27 : i32 to vector<8x256xi32>
    %29 = arith.cmpi slt, %28, %8 : vector<8x256xi32>
    %30 = arith.andi %26, %29 : vector<8x256xi1>
    %31 = arith.truncf %10 : vector<8x256xf32> to vector<8x256xbf16>
    %cst = arith.constant dense<0.000000e+00> : vector<8x768xf32>
    %32 = tpu.matmul %31, %3, %cst {dimension_numbers = #tpu.dot_dimension_numbers<[1], [0], [0], [1], [0, 0, 1, 1], [], []>} : vector<8x256xbf16>, vector<256x768xbf16>, vector<8x768xf32> -> vector<8x768xf32>
    %33 = vector.extract_strided_slice %32 {offsets = [0, 0], sizes = [8, 256], strides = [1, 1]} : vector<8x768xf32> to vector<8x256xf32>
    %34 = arith.addf %15, %33 : vector<8x256xf32>
    %35 = arith.negf %34 : vector<8x256xf32>
    %36 = math.exp %35 : vector<8x256xf32>
    %cst_19 = arith.constant 1.000000e+00 : f32
    %37 = vector.broadcast %cst_19 : f32 to vector<8x256xf32>
    %38 = arith.addf %37, %36 : vector<8x256xf32>
    %39 = arith.divf %37, %38 : vector<8x256xf32>
    %40 = vector.extract_strided_slice %32 {offsets = [0, 256], sizes = [8, 256], strides = [1, 1]} : vector<8x768xf32> to vector<8x256xf32>
    %41 = arith.addf %19, %40 : vector<8x256xf32>
    %42 = arith.negf %41 : vector<8x256xf32>
    %43 = math.exp %42 : vector<8x256xf32>
    %cst_20 = arith.constant 1.000000e+00 : f32
    %44 = vector.broadcast %cst_20 : f32 to vector<8x256xf32>
    %45 = arith.addf %44, %43 : vector<8x256xf32>
    %46 = arith.divf %44, %45 : vector<8x256xf32>
    %47 = vector.extract_strided_slice %32 {offsets = [0, 512], sizes = [8, 256], strides = [1, 1]} : vector<8x768xf32> to vector<8x256xf32>
    %48 = arith.addf %47, %6 : vector<8x256xf32>
    %49 = arith.mulf %39, %48 : vector<8x256xf32>
    %50 = arith.addf %23, %49 : vector<8x256xf32>
    %51 = math.tanh %50 : vector<8x256xf32>
    %cst_21 = arith.constant 1.000000e+00 : f32
    %52 = vector.broadcast %cst_21 : f32 to vector<8x256xf32>
    %53 = arith.subf %52, %46 : vector<8x256xf32>
    %54 = arith.mulf %53, %51 : vector<8x256xf32>
    %55 = arith.mulf %46, %10 : vector<8x256xf32>
    %56 = arith.addf %54, %55 : vector<8x256xf32>
    %57 = arith.select %30, %56, %10 : vector<8x256xi1>, vector<8x256xf32>
    %58 = arith.maximumf %11, %56 : vector<8x256xf32>
    %59 = arith.select %30, %58, %11 : vector<8x256xi1>, vector<8x256xf32>
    %c1_i32 = arith.constant 1 : i32
    %60 = arith.index_cast %c1_i32 : i32 to index
    %c0_22 = arith.constant 0 : index
    %c0_23 = arith.constant 0 : index
    %61 = vector.load %arg2[%60, %c0_22, %c0_23] : memref<4x8x256xbf16, #tpu.memory_space<vmem>>, vector<1x8x256xbf16>
    %62 = vector.shape_cast %61 : vector<1x8x256xbf16> to vector<8x256xbf16>
    %63 = arith.extf %62 : vector<8x256xbf16> to vector<8x256xf32>
    %64 = arith.index_cast %c1_i32 : i32 to index
    %c0_24 = arith.constant 0 : index
    %c0_25 = arith.constant 0 : index
    %65 = vector.load %arg3[%64, %c0_24, %c0_25] : memref<4x8x256xbf16, #tpu.memory_space<vmem>>, vector<1x8x256xbf16>
    %66 = vector.shape_cast %65 : vector<1x8x256xbf16> to vector<8x256xbf16>
    %67 = arith.extf %66 : vector<8x256xbf16> to vector<8x256xf32>
    %68 = arith.index_cast %c1_i32 : i32 to index
    %c0_26 = arith.constant 0 : index
    %c0_27 = arith.constant 0 : index
    %69 = vector.load %arg4[%68, %c0_26, %c0_27] : memref<4x8x256xbf16, #tpu.memory_space<vmem>>, vector<1x8x256xbf16>
    %70 = vector.shape_cast %69 : vector<1x8x256xbf16> to vector<8x256xbf16>
    %71 = arith.extf %70 : vector<8x256xbf16> to vector<8x256xf32>
    %72 = arith.addi %9, %c1_i32 : i32
    %73 = vector.broadcast %72 : i32 to vector<8x256xi32>
    %74 = arith.cmpi sge, %73, %7 : vector<8x256xi32>
    %75 = arith.addi %9, %c1_i32 : i32
    %76 = vector.broadcast %75 : i32 to vector<8x256xi32>
    %77 = arith.cmpi slt, %76, %8 : vector<8x256xi32>
    %78 = arith.andi %74, %77 : vector<8x256xi1>
    %79 = arith.truncf %57 : vector<8x256xf32> to vector<8x256xbf16>
    %cst_28 = arith.constant dense<0.000000e+00> : vector<8x768xf32>
    %80 = tpu.matmul %79, %3, %cst_28 {dimension_numbers = #tpu.dot_dimension_numbers<[1], [0], [0], [1], [0, 0, 1, 1], [], []>} : vector<8x256xbf16>, vector<256x768xbf16>, vector<8x768xf32> -> vector<8x768xf32>
    %81 = vector.extract_strided_slice %80 {offsets = [0, 0], sizes = [8, 256], strides = [1, 1]} : vector<8x768xf32> to vector<8x256xf32>
    %82 = arith.addf %63, %81 : vector<8x256xf32>
    %83 = arith.negf %82 : vector<8x256xf32>
    %84 = math.exp %83 : vector<8x256xf32>
    %cst_29 = arith.constant 1.000000e+00 : f32
    %85 = vector.broadcast %cst_29 : f32 to vector<8x256xf32>
    %86 = arith.addf %85, %84 : vector<8x256xf32>
    %87 = arith.divf %85, %86 : vector<8x256xf32>
    %88 = vector.extract_strided_slice %80 {offsets = [0, 256], sizes = [8, 256], strides = [1, 1]} : vector<8x768xf32> to vector<8x256xf32>
    %89 = arith.addf %67, %88 : vector<8x256xf32>
    %90 = arith.negf %89 : vector<8x256xf32>
    %91 = math.exp %90 : vector<8x256xf32>
    %cst_30 = arith.constant 1.000000e+00 : f32
    %92 = vector.broadcast %cst_30 : f32 to vector<8x256xf32>
    %93 = arith.addf %92, %91 : vector<8x256xf32>
    %94 = arith.divf %92, %93 : vector<8x256xf32>
    %95 = vector.extract_strided_slice %80 {offsets = [0, 512], sizes = [8, 256], strides = [1, 1]} : vector<8x768xf32> to vector<8x256xf32>
    %96 = arith.addf %95, %6 : vector<8x256xf32>
    %97 = arith.mulf %87, %96 : vector<8x256xf32>
    %98 = arith.addf %71, %97 : vector<8x256xf32>
    %99 = math.tanh %98 : vector<8x256xf32>
    %cst_31 = arith.constant 1.000000e+00 : f32
    %100 = vector.broadcast %cst_31 : f32 to vector<8x256xf32>
    %101 = arith.subf %100, %94 : vector<8x256xf32>
    %102 = arith.mulf %101, %99 : vector<8x256xf32>
    %103 = arith.mulf %94, %57 : vector<8x256xf32>
    %104 = arith.addf %102, %103 : vector<8x256xf32>
    %105 = arith.select %78, %104, %57 : vector<8x256xi1>, vector<8x256xf32>
    %106 = arith.maximumf %59, %104 : vector<8x256xf32>
    %107 = arith.select %78, %106, %59 : vector<8x256xi1>, vector<8x256xf32>
    %c2_i32 = arith.constant 2 : i32
    %108 = arith.index_cast %c2_i32 : i32 to index
    %c0_32 = arith.constant 0 : index
    %c0_33 = arith.constant 0 : index
    %109 = vector.load %arg2[%108, %c0_32, %c0_33] : memref<4x8x256xbf16, #tpu.memory_space<vmem>>, vector<1x8x256xbf16>
    %110 = vector.shape_cast %109 : vector<1x8x256xbf16> to vector<8x256xbf16>
    %111 = arith.extf %110 : vector<8x256xbf16> to vector<8x256xf32>
    %112 = arith.index_cast %c2_i32 : i32 to index
    %c0_34 = arith.constant 0 : index
    %c0_35 = arith.constant 0 : index
    %113 = vector.load %arg3[%112, %c0_34, %c0_35] : memref<4x8x256xbf16, #tpu.memory_space<vmem>>, vector<1x8x256xbf16>
    %114 = vector.shape_cast %113 : vector<1x8x256xbf16> to vector<8x256xbf16>
    %115 = arith.extf %114 : vector<8x256xbf16> to vector<8x256xf32>
    %116 = arith.index_cast %c2_i32 : i32 to index
    %c0_36 = arith.constant 0 : index
    %c0_37 = arith.constant 0 : index
    %117 = vector.load %arg4[%116, %c0_36, %c0_37] : memref<4x8x256xbf16, #tpu.memory_space<vmem>>, vector<1x8x256xbf16>
    %118 = vector.shape_cast %117 : vector<1x8x256xbf16> to vector<8x256xbf16>
    %119 = arith.extf %118 : vector<8x256xbf16> to vector<8x256xf32>
    %120 = arith.addi %9, %c2_i32 : i32
    %121 = vector.broadcast %120 : i32 to vector<8x256xi32>
    %122 = arith.cmpi sge, %121, %7 : vector<8x256xi32>
    %123 = arith.addi %9, %c2_i32 : i32
    %124 = vector.broadcast %123 : i32 to vector<8x256xi32>
    %125 = arith.cmpi slt, %124, %8 : vector<8x256xi32>
    %126 = arith.andi %122, %125 : vector<8x256xi1>
    %127 = arith.truncf %105 : vector<8x256xf32> to vector<8x256xbf16>
    %cst_38 = arith.constant dense<0.000000e+00> : vector<8x768xf32>
    %128 = tpu.matmul %127, %3, %cst_38 {dimension_numbers = #tpu.dot_dimension_numbers<[1], [0], [0], [1], [0, 0, 1, 1], [], []>} : vector<8x256xbf16>, vector<256x768xbf16>, vector<8x768xf32> -> vector<8x768xf32>
    %129 = vector.extract_strided_slice %128 {offsets = [0, 0], sizes = [8, 256], strides = [1, 1]} : vector<8x768xf32> to vector<8x256xf32>
    %130 = arith.addf %111, %129 : vector<8x256xf32>
    %131 = arith.negf %130 : vector<8x256xf32>
    %132 = math.exp %131 : vector<8x256xf32>
    %cst_39 = arith.constant 1.000000e+00 : f32
    %133 = vector.broadcast %cst_39 : f32 to vector<8x256xf32>
    %134 = arith.addf %133, %132 : vector<8x256xf32>
    %135 = arith.divf %133, %134 : vector<8x256xf32>
    %136 = vector.extract_strided_slice %128 {offsets = [0, 256], sizes = [8, 256], strides = [1, 1]} : vector<8x768xf32> to vector<8x256xf32>
    %137 = arith.addf %115, %136 : vector<8x256xf32>
    %138 = arith.negf %137 : vector<8x256xf32>
    %139 = math.exp %138 : vector<8x256xf32>
    %cst_40 = arith.constant 1.000000e+00 : f32
    %140 = vector.broadcast %cst_40 : f32 to vector<8x256xf32>
    %141 = arith.addf %140, %139 : vector<8x256xf32>
    %142 = arith.divf %140, %141 : vector<8x256xf32>
    %143 = vector.extract_strided_slice %128 {offsets = [0, 512], sizes = [8, 256], strides = [1, 1]} : vector<8x768xf32> to vector<8x256xf32>
    %144 = arith.addf %143, %6 : vector<8x256xf32>
    %145 = arith.mulf %135, %144 : vector<8x256xf32>
    %146 = arith.addf %119, %145 : vector<8x256xf32>
    %147 = math.tanh %146 : vector<8x256xf32>
    %cst_41 = arith.constant 1.000000e+00 : f32
    %148 = vector.broadcast %cst_41 : f32 to vector<8x256xf32>
    %149 = arith.subf %148, %142 : vector<8x256xf32>
    %150 = arith.mulf %149, %147 : vector<8x256xf32>
    %151 = arith.mulf %142, %105 : vector<8x256xf32>
    %152 = arith.addf %150, %151 : vector<8x256xf32>
    %153 = arith.select %126, %152, %105 : vector<8x256xi1>, vector<8x256xf32>
    %154 = arith.maximumf %107, %152 : vector<8x256xf32>
    %155 = arith.select %126, %154, %107 : vector<8x256xi1>, vector<8x256xf32>
    %c3_i32 = arith.constant 3 : i32
    %156 = arith.index_cast %c3_i32 : i32 to index
    %c0_42 = arith.constant 0 : index
    %c0_43 = arith.constant 0 : index
    %157 = vector.load %arg2[%156, %c0_42, %c0_43] : memref<4x8x256xbf16, #tpu.memory_space<vmem>>, vector<1x8x256xbf16>
    %158 = vector.shape_cast %157 : vector<1x8x256xbf16> to vector<8x256xbf16>
    %159 = arith.extf %158 : vector<8x256xbf16> to vector<8x256xf32>
    %160 = arith.index_cast %c3_i32 : i32 to index
    %c0_44 = arith.constant 0 : index
    %c0_45 = arith.constant 0 : index
    %161 = vector.load %arg3[%160, %c0_44, %c0_45] : memref<4x8x256xbf16, #tpu.memory_space<vmem>>, vector<1x8x256xbf16>
    %162 = vector.shape_cast %161 : vector<1x8x256xbf16> to vector<8x256xbf16>
    %163 = arith.extf %162 : vector<8x256xbf16> to vector<8x256xf32>
    %164 = arith.index_cast %c3_i32 : i32 to index
    %c0_46 = arith.constant 0 : index
    %c0_47 = arith.constant 0 : index
    %165 = vector.load %arg4[%164, %c0_46, %c0_47] : memref<4x8x256xbf16, #tpu.memory_space<vmem>>, vector<1x8x256xbf16>
    %166 = vector.shape_cast %165 : vector<1x8x256xbf16> to vector<8x256xbf16>
    %167 = arith.extf %166 : vector<8x256xbf16> to vector<8x256xf32>
    %168 = arith.addi %9, %c3_i32 : i32
    %169 = vector.broadcast %168 : i32 to vector<8x256xi32>
    %170 = arith.cmpi sge, %169, %7 : vector<8x256xi32>
    %171 = arith.addi %9, %c3_i32 : i32
    %172 = vector.broadcast %171 : i32 to vector<8x256xi32>
    %173 = arith.cmpi slt, %172, %8 : vector<8x256xi32>
    %174 = arith.andi %170, %173 : vector<8x256xi1>
    %175 = arith.truncf %153 : vector<8x256xf32> to vector<8x256xbf16>
    %cst_48 = arith.constant dense<0.000000e+00> : vector<8x768xf32>
    %176 = tpu.matmul %175, %3, %cst_48 {dimension_numbers = #tpu.dot_dimension_numbers<[1], [0], [0], [1], [0, 0, 1, 1], [], []>} : vector<8x256xbf16>, vector<256x768xbf16>, vector<8x768xf32> -> vector<8x768xf32>
    %177 = vector.extract_strided_slice %176 {offsets = [0, 0], sizes = [8, 256], strides = [1, 1]} : vector<8x768xf32> to vector<8x256xf32>
    %178 = arith.addf %159, %177 : vector<8x256xf32>
    %179 = arith.negf %178 : vector<8x256xf32>
    %180 = math.exp %179 : vector<8x256xf32>
    %cst_49 = arith.constant 1.000000e+00 : f32
    %181 = vector.broadcast %cst_49 : f32 to vector<8x256xf32>
    %182 = arith.addf %181, %180 : vector<8x256xf32>
    %183 = arith.divf %181, %182 : vector<8x256xf32>
    %184 = vector.extract_strided_slice %176 {offsets = [0, 256], sizes = [8, 256], strides = [1, 1]} : vector<8x768xf32> to vector<8x256xf32>
    %185 = arith.addf %163, %184 : vector<8x256xf32>
    %186 = arith.negf %185 : vector<8x256xf32>
    %187 = math.exp %186 : vector<8x256xf32>
    %cst_50 = arith.constant 1.000000e+00 : f32
    %188 = vector.broadcast %cst_50 : f32 to vector<8x256xf32>
    %189 = arith.addf %188, %187 : vector<8x256xf32>
    %190 = arith.divf %188, %189 : vector<8x256xf32>
    %191 = vector.extract_strided_slice %176 {offsets = [0, 512], sizes = [8, 256], strides = [1, 1]} : vector<8x768xf32> to vector<8x256xf32>
    %192 = arith.addf %191, %6 : vector<8x256xf32>
    %193 = arith.mulf %183, %192 : vector<8x256xf32>
    %194 = arith.addf %167, %193 : vector<8x256xf32>
    %195 = math.tanh %194 : vector<8x256xf32>
    %cst_51 = arith.constant 1.000000e+00 : f32
    %196 = vector.broadcast %cst_51 : f32 to vector<8x256xf32>
    %197 = arith.subf %196, %190 : vector<8x256xf32>
    %198 = arith.mulf %197, %195 : vector<8x256xf32>
    %199 = arith.mulf %190, %153 : vector<8x256xf32>
    %200 = arith.addf %198, %199 : vector<8x256xf32>
    %201 = arith.select %174, %200, %153 : vector<8x256xi1>, vector<8x256xf32>
    %202 = arith.maximumf %155, %200 : vector<8x256xf32>
    %203 = arith.select %174, %202, %155 : vector<8x256xi1>, vector<8x256xf32>
    %c4_i32_52 = arith.constant 4 : i32
    %c0_53 = arith.constant 0 : index
    %c0_54 = arith.constant 0 : index
    %204 = vector.load %arg14[%c0_53, %c0_54] : memref<8x256xf32, #tpu.memory_space<vmem>>, vector<8x256xf32>
    tpu.vector_store %arg14[%c0_53, %c0_54], %201 {strides = array<i32>} : memref<8x256xf32, #tpu.memory_space<vmem>>, vector<8x256xf32>,
    %c0_55 = arith.constant 0 : index
    %c0_56 = arith.constant 0 : index
    %205 = vector.load %arg15[%c0_55, %c0_56] : memref<8x256xf32, #tpu.memory_space<vmem>>, vector<8x256xf32>
    tpu.vector_store %arg15[%c0_55, %c0_56], %203 {strides = array<i32>} : memref<8x256xf32, #tpu.memory_space<vmem>>, vector<8x256xf32>,
    %c1_i32_57 = arith.constant 1 : i32
    %206 = arith.cmpi eq, %arg1, %c1_i32_57 : i32
    %207 = arith.extui %206 : i1 to i32
    %c0_i32_58 = arith.constant 0 : i32
    %208 = arith.cmpi ne, %207, %c0_i32_58 : i32
    scf.if %208 {
      %209 = arith.truncf %203 : vector<8x256xf32> to vector<8x256xbf16>
      %c0_59 = arith.constant 0 : index
      %c0_60 = arith.constant 0 : index
      %210 = vector.load %arg9[%c0_59, %c0_60] : memref<256x128xbf16, #tpu.memory_space<vmem>>, vector<256x128xbf16>
      %cst_61 = arith.constant dense<0.000000e+00> : vector<8x128xf32>
      %211 = tpu.matmul %209, %210, %cst_61 {dimension_numbers = #tpu.dot_dimension_numbers<[1], [0], [0], [1], [0, 0, 1, 1], [], []>} : vector<8x256xbf16>, vector<256x128xbf16>, vector<8x128xf32> -> vector<8x128xf32>
      %c0_62 = arith.constant 0 : index
      %c0_63 = arith.constant 0 : index
      %212 = vector.load %arg10[%c0_62, %c0_63] : memref<1x128xf32, #tpu.memory_space<vmem>>, vector<1x128xf32>
      %213 = vector.broadcast %212 : vector<1x128xf32> to vector<8x128xf32>
      %214 = arith.addf %211, %213 : vector<8x128xf32>
      %cst_64 = arith.constant 0.000000e+00 : f32
      %215 = vector.broadcast %cst_64 : f32 to vector<8x128xf32>
      %216 = arith.maximumf %214, %215 : vector<8x128xf32>
      %217 = arith.truncf %216 : vector<8x128xf32> to vector<8x128xbf16>
      %c0_65 = arith.constant 0 : index
      %c0_66 = arith.constant 0 : index
      %218 = vector.load %arg11[%c0_65, %c0_66] : memref<128x128xbf16, #tpu.memory_space<vmem>>, vector<128x128xbf16>
      %cst_67 = arith.constant dense<0.000000e+00> : vector<8x128xf32>
      %219 = tpu.matmul %217, %218, %cst_67 {dimension_numbers = #tpu.dot_dimension_numbers<[1], [0], [0], [1], [0, 0, 1, 1], [], []>} : vector<8x128xbf16>, vector<128x128xbf16>, vector<8x128xf32> -> vector<8x128xf32>
      %c0_68 = arith.constant 0 : index
      %c0_69 = arith.constant 0 : index
      %220 = vector.load %arg12[%c0_68, %c0_69] : memref<1x128xf32, #tpu.memory_space<vmem>>, vector<1x128xf32>
      %221 = vector.broadcast %220 : vector<1x128xf32> to vector<8x128xf32>
      %222 = arith.addf %219, %221 : vector<8x128xf32>
      %c0_70 = arith.constant 0 : index
      %c0_71 = arith.constant 0 : index
      %223 = vector.load %arg13[%c0_70, %c0_71] : memref<8x128xf32, #tpu.memory_space<vmem>>, vector<8x128xf32>
      tpu.vector_store %arg13[%c0_70, %c0_71], %222 {strides = array<i32>} : memref<8x128xf32, #tpu.memory_space<vmem>>, vector<8x128xf32>,
    } else {
    }
    return
  }
  func.func @transform_0(%arg0: i32, %arg1: i32) -> (i32, i32, i32) {
    %c0_i32 = arith.constant 0 : i32
    %c0_i32_0 = arith.constant 0 : i32
    return %arg1, %arg0, %c0_i32 : i32, i32, i32
  }
  func.func @transform_1(%arg0: i32, %arg1: i32) -> (i32, i32, i32) {
    %c0_i32 = arith.constant 0 : i32
    %c0_i32_0 = arith.constant 0 : i32
    return %arg1, %arg0, %c0_i32 : i32, i32, i32
  }
  func.func @transform_2(%arg0: i32, %arg1: i32) -> (i32, i32, i32) {
    %c0_i32 = arith.constant 0 : i32
    %c0_i32_0 = arith.constant 0 : i32
    return %arg1, %arg0, %c0_i32 : i32, i32, i32
  }
  func.func @transform_3(%arg0: i32, %arg1: i32) -> (i32, i32) {
    %c0_i32 = arith.constant 0 : i32
    %c0_i32_0 = arith.constant 0 : i32
    return %arg0, %c0_i32 : i32, i32
  }
  func.func @transform_4(%arg0: i32, %arg1: i32) -> (i32, i32) {
    %c0_i32 = arith.constant 0 : i32
    %c0_i32_0 = arith.constant 0 : i32
    return %arg0, %c0_i32 : i32, i32
  }
  func.func @transform_5(%arg0: i32, %arg1: i32) -> (i32, i32) {
    %c0_i32 = arith.constant 0 : i32
    %c0_i32_0 = arith.constant 0 : i32
    %c0_i32_1 = arith.constant 0 : i32
    return %c0_i32, %c0_i32_0 : i32, i32
  }
  func.func @transform_6(%arg0: i32, %arg1: i32) -> (i32, i32) {
    %c0_i32 = arith.constant 0 : i32
    %c0_i32_0 = arith.constant 0 : i32
    %c0_i32_1 = arith.constant 0 : i32
    return %c0_i32, %c0_i32_0 : i32, i32
  }
  func.func @transform_7(%arg0: i32, %arg1: i32) -> (i32, i32) {
    %c0_i32 = arith.constant 0 : i32
    %c0_i32_0 = arith.constant 0 : i32
    %c0_i32_1 = arith.constant 0 : i32
    return %c0_i32, %c0_i32_0 : i32, i32
  }
  func.func @transform_8(%arg0: i32, %arg1: i32) -> (i32, i32) {
    %c0_i32 = arith.constant 0 : i32
    %c0_i32_0 = arith.constant 0 : i32
    %c0_i32_1 = arith.constant 0 : i32
    return %c0_i32, %c0_i32_0 : i32, i32
  }
  func.func @transform_9(%arg0: i32, %arg1: i32) -> (i32, i32) {
    %c0_i32 = arith.constant 0 : i32
    %c0_i32_0 = arith.constant 0 : i32
    %c0_i32_1 = arith.constant 0 : i32
    return %c0_i32, %c0_i32_0 : i32, i32
  }
  func.func @transform_10(%arg0: i32, %arg1: i32) -> (i32, i32) {
    %c0_i32 = arith.constant 0 : i32
    %c0_i32_0 = arith.constant 0 : i32
    %c0_i32_1 = arith.constant 0 : i32
    return %c0_i32, %c0_i32_0 : i32, i32
  }
  func.func @transform_11(%arg0: i32, %arg1: i32) -> (i32, i32) {
    %c0_i32 = arith.constant 0 : i32
    %c0_i32_0 = arith.constant 0 : i32
    return %arg0, %c0_i32 : i32, i32
  }
}

</mosaic_0001>

<bundles_post_ra>
// kernel: tpu_custom_call.1
= control target key start
LH: loop header
LB: loop body
LE: loop exit
PB: predicated region body
PF: predicated region fallthrough
CT: control target
= control target key end

     0   :  { %s4585_s0 = inlined_call_operand.hbm [shape: bf16[8,8,256], index: 0, kind: input, shape index: {}]   ;;  %s4586_s1 = inlined_call_operand.hbm [shape: bf16[8,8,256], index: 1, kind: input, shape index: {}]   ;;  %s4587_s2 = inlined_call_operand.hbm [shape: bf16[8,8,256], index: 2, kind: input, shape index: {}]   ;;  %s4588_s3 = inlined_call_operand.hbm [shape: s32[8,256], index: 3, kind: input, shape index: {}]   ;;  %s4589_s4 = inlined_call_operand.hbm [shape: s32[8,256], index: 4, kind: input, shape index: {}]   ;;  %s4590_s5 = inlined_call_operand.hbm [shape: bf16[256,768], index: 5, kind: input, shape index: {}]   ;;  %s4591_s6 = inlined_call_operand.vmem [shape: f32[1,256], index: 6, kind: input, shape index: {}]   ;;  %s4592_s7 = inlined_call_operand.hbm [shape: bf16[256,128], index: 7, kind: input, shape index: {}]   ;;  %s4593_s8 = inlined_call_operand.vmem [shape: f32[1,128], index: 8, kind: input, shape index: {}]   ;;  %s4594_s9 = inlined_call_operand.hbm [shape: bf16[128,128], index: 9, kind: input, shape index: {}]   ;;  %s4595_s10 = inlined_call_operand.vmem [shape: f32[1,128], index: 10, kind: input, shape index: {}]   ;;  %s4596_s11 = inlined_call_operand.hbm [shape: f32[8,128], index: 11, kind: output, shape index: {}]  }
   0x1   :  { %4720 = sst [smem:[#allocation89_spill]] %s4586_s1 }
   0x2   :  { %4721 = sst [smem:[#allocation90_spill]] %s4588_s3 }
   0x3   :  { %4722 = sst [smem:[#allocation91_spill]] %s4589_s4 }
   0x4   :  { %4723 = sst [smem:[#allocation92_spill]] %s4590_s5 }
   0x5   :  { %4724 = sst [smem:[#allocation93_spill]] %s4591_s6 }
   0x6   :  { %4725 = sst [smem:[#allocation94_spill]] %s4593_s8 }
   0x7   :  { %4726 = sst [smem:[#allocation95_spill]] %s4595_s10 }
   0x8   :  { %4727 = sst [smem:[#allocation96_spill]] %s4596_s11 }
   0x9   :  { %16 = vsyncpa [#allocation5], 0 }
   0xa   :  { %18 = vsyncpa [#allocation5 + $0x1], 0 }
   0xb   :  { %19 = vsyncpa [#allocation8], 0 }
   0xc   :  { %21 = vsyncpa [#allocation8 + $0x1], 0 }
   0xd   :  { %22 = vsyncpa [#allocation11], 0 }
   0xe   :  { %23 = vsyncpa [#allocation14], 0 }
   0xf   :  { %24 = vsyncpa [#allocation17], 0 }
  0x10   :  { %25 = vsyncpa [#allocation6], 0  ;;  %s3564_s17 = smov 0   ;;  %s3566_s18 = smov 0  }
  0x11   :  { %s3568_s19 = smov 0   ;;  %s3570_s20 = smov 0  }
  0x12   :  { %s3572_s21 = smov 0   ;;  %s3574_s22 = smov 0  }
  0x13 LB: > { %4728 = sst [smem:[#allocation25_spill]] %s3475_s20  ;;  %s3595_s23 = sadd.s32 4294967295, %s3483_s22   ;;  %s3483_s22 = sphi %s3574_s22, %s31_s22   ;;  %s3479_s21 = sphi %s3572_s21, %s4894_s21   ;;  %s3475_s20 = sphi %s3570_s20, %s4893_s20   ;;  %s3471_s19 = sphi %s3568_s19, %s4897_s19   ;;  %s3467_s18 = sphi %s3566_s18, %s4896_s18   ;;  %s3463_s17 = sphi %s3564_s17, %s4895_s17  }
  0x14   : > { %4729 = sst [smem:[#allocation26_spill]] %s3479_s21  ;;  %p2446_p0 = scmp.ge.s32.totalorder %s3483_s22, 1 }
  0x15   : > { %4730 = sst [smem:[#allocation27_spill]] %s3483_s22  ;;  %p4597_p1 = scmp.eq.s32.totalorder %s3595_s23, 0 }
  0x16   : > { %p336_p2 = scmp.lt.s32.totalorder %s3483_s22, 3  ;;  %s3485_s25 = smov [#allocation10]  }
  0x17   : > { %s352_s26 = sshll.u32 %s3485_s25, 4  ;;  %s3486_s27 = smov [#allocation13]   ;;  %s353_s26 = int_to_ptr.vmem [resolvable:$true] %s352_s26 }
  0x18   : > { %p3600_p3 = pnand %p2446_p0, %p336_p2  ;;  %s376_s28 = sshll.u32 %s3486_s27, 4  ;;  %s3612_s28 = int_to_ptr.vmem [resolvable:$true] %s376_s28 }
  0x19   : > { %s4733_s3 = sld [smem:[#allocation90_spill]] }
  0x1a   : > { %s4731_s24 = scalar_select %p3600_p3, 1, 0 }
  0x1b   : > { %p2715_p4 = pneg %p3600_p3 }
  0x1d   : > { %p3608_p5 = pnand %p2715_p4, %p4597_p1 }
  0x1f   : > { %s4732_s29 = scalar_select %p3608_p5, 1, 0 }
  0x20   : > { %s3157_s13 = scalar_lea.hbm %s4733_s3, 256  ;;  %p3622_p7 = pneg %p3608_p5 }
  0x21   : > { %p3158_p6 = scmp.ne.s32.totalorder %s4733_s3, %s3157_s13  ;;  %p3164_p10 = scmp.lt.u32.totalorder %s3157_s13, %s4733_s3 }
  0x22   : > { %s4734_s16 = scalar_select %p3622_p7, 1, 0 }
  0x23   : > { %p3160_p8 = pnand %p3622_p7, %p3158_p6 }
  0x25   : > { %p3161_p9 = pneg %p3160_p8 }
  0x27   : > { %p3166_p11 = pnand %p3164_p10, %p3161_p9 }
  0x29   : > { %3169 = shalt.err (!%p3166_p11)
}
  0x2a   : > { %s3170_s30 = scalar_lea.vmem %s353_s26, 256  ;;  %p3178_p2 = scmp.lt.s32.totalorder %s353_s26, %s353_s26 }
  0x2b   : > { %p3171_p12 = scmp.ne.s32.totalorder %s353_s26, %s3170_s30  ;;  %p3179_p4 = scmp.lt.s32.totalorder %s3170_s30, %s3170_s30 }
  0x2d   : > { %p3173_p13 = pnand %p3171_p12, %p3622_p7  ;;  %p3180_p1 = por %p3179_p4, %p3178_p2 }
  0x2f   : > { %p3174_p0 = pneg %p3173_p13 }
  0x31   : > { %p3181_p3 = pnand %p3180_p1, %p3174_p0 }
  0x33   : > { %3184 = shalt.err (!%p3181_p3)
}
  0x34   : > { %2718 = dma.hbm_to_vmem [thread:$0]  (!%p3608_p5), %s4733_s3, 256, %s353_s26, [#allocation11]  }
  0x35   : > { %s4735_s5 = sld [smem:[#allocation92_spill]] }
  0x3b   : > { %s3185_s25 = scalar_lea.hbm %s4735_s5, 12288 }
  0x3c   : > { %p3186_p6 = scmp.ne.s32.totalorder %s4735_s5, %s3185_s25  ;;  %p3192_p1 = scmp.lt.u32.totalorder %s3185_s25, %s4735_s5 }
  0x3e   : > { %p3188_p8 = pnand %p3186_p6, %p3622_p7 }
  0x40   : > { %p3189_p9 = pneg %p3188_p8 }
  0x42   : > { %p3194_p3 = pnand %p3192_p1, %p3189_p9 }
  0x44   : > { %3197 = shalt.err (!%p3194_p3)
}
  0x45   : > { %s3198_s26 = scalar_lea.vmem %s3612_s28, 12288  ;;  %p3206_p13 = scmp.lt.s32.totalorder %s3612_s28, %s3612_s28 }
  0x46   : > { %p3199_p10 = scmp.ne.s32.totalorder %s3612_s28, %s3198_s26  ;;  %p3207_p0 = scmp.lt.s32.totalorder %s3198_s26, %s3198_s26 }
  0x48   : > { %p3201_p11 = pnand %p3199_p10, %p3622_p7  ;;  %p3208_p2 = por %p3207_p0, %p3206_p13 }
  0x4a   : > { %p3202_p12 = pneg %p3201_p11 }
  0x4c   : > { %p3209_p4 = pnand %p3208_p2, %p3202_p12 }
  0x4e   : > { %3212 = shalt.err (!%p3209_p4)
}
  0x4f   : > { %s3487_s11 = smov 384   ;;  %s3488_s10 = smov 24  }
  0x50   : > { %2724 = dma.hbm_to_vmem [thread:$0]  (!%p3608_p5), %s4735_s5, 12288, %s3612_s28, [#allocation14], %s3487_s11, %s3487_s11, %s3488_s10  }
  0x51   : > { %s40_s13 = sadd.s32 1, %s3479_s21  ;;  %s52_s15 = sadd.s32 1, %s3471_s19 }
  0x52   : > { %p41_p6 = scmp.ge.s32.totalorder %s40_s13, 2  ;;  %p59_p8 = scmp.ne.s32.totalorder %s3471_s19, %s3467_s18 }
  0x53   : > { %p60_p9 = scmp.eq.s32.totalorder %s3483_s22, 0  ;;  %p65_p1 = scmp.ne.s32.totalorder %s3467_s18, %s3463_s17 }
  0x54   : > { %s4899_s13 = smov (%p41_p6, %s40_s13), 0  ;;  %p4737_p10 = scmp.eq.s32.totalorder %s3595_s23, 0 }
  0x55   : > { %4736 = sst [smem:[#allocation28_spill]] %s4899_s13  ;;  %p61_p3 = por %p60_p9, %p59_p8 }
  0x56   : > { %p3672_p11 = por %p4737_p10, %p65_p1  ;;  %s47_s27 = ssub.s32 %s3479_s21, %s4899_s13 }
  0x57   : > { %p2746_p12 = scmp.lt.s32.totalorder %s3483_s22, 2  ;;  %p50_p13 = scmp.eq.s32.totalorder %s47_s27, 0 }
  0x58   : > { %s4738_s25 = scalar_select %p3672_p11, 1, 0 }
  0x59   : > { %s4600_s28 = sand.u32 1, %s3471_s19   ;;  %s3685_s26 = sshll.u32 %s3479_s21, 9 }
  0x5a   : > { %s3682_s30 = sshll.u32 %s4600_s28, 5  ;;  %p3690_p0 = pnand %p2746_p12, %p61_p3 }
  0x5b   : > { %s3688_s17 = scalar_select %p50_p13, %s3471_s19, %s52_s15  }
  0x5c   : > { %s4740_s11 = scalar_select %p3690_p0, 1, 0 }
  0x5d   : > { %4739 = sst [smem:[#allocation29_spill]] %s3688_s17  ;;  %s449_s10 = sand.u32 1, %s3483_s22  }
  0x5e   : > { %s4741_s1 = sld [smem:[#allocation89_spill]]  ;;  %s453_s28 = scalar_lea.vmem [#allocation7], %s3682_s30 }
  0x5f   : > { %s463_s3 = sshll.u32 %s453_s28, 4  ;;  %s3489_s15 = smov [#allocation12]   ;;  %s3702_s3 = int_to_ptr.vmem [resolvable:$true] %s463_s3 }
  0x60   : > { %s3704_s5 = sshll.u32 %s3489_s15, 4  ;;  %s3706_s13 = scalar_lea.sflag [#allocation8], %s449_s10  ;;  %s367_s5 = int_to_ptr.vmem [resolvable:$true] %s3704_s5 }
  0x61   : > { %p3712_p4 = pneg %p3690_p0 }
  0x63   : > { %s4742_s12 = scalar_select %p3712_p4, 1, 0 }
  0x64   : > { %s3699_s27 = scalar_lea.hbm %s4741_s1, %s3685_s26  ;;  %s3218_s17 = scalar_lea.hbm %s4741_s1, 1024 }
  0x65   : > { %s3213_s21 = scalar_lea.hbm %s3699_s27, 512  ;;  %p3219_p9 = scmp.lt.u32.totalorder %s3699_s27, %s4741_s1 }
  0x66   : > { %p3214_p2 = scmp.ne.s32.totalorder %s3699_s27, %s3213_s21  ;;  %p3220_p1 = scmp.lt.u32.totalorder %s3218_s17, %s3213_s21 }
  0x67   : > { %p3222_p10 = scmp.lt.u32.totalorder %s3213_s21, %s3699_s27 }
  0x68   : > { %p3216_p6 = pnand %p3712_p4, %p3214_p2  ;;  %p3221_p3 = por %p3220_p1, %p3219_p9 }
  0x6a   : > { %p3217_p8 = pneg %p3216_p6  ;;  %p3223_p12 = por %p3222_p10, %p3221_p3 }
  0x6c   : > { %p3224_p13 = pnand %p3223_p12, %p3217_p8 }
  0x6e   : > { %3227 = shalt.err (!%p3224_p13)
}
  0x6f   : > { %s3228_s10 = scalar_lea.vmem %s3702_s3, 512  ;;  %s3490_s14 = smov [#allocation7]  }
  0x70   : > { %p3229_p2 = scmp.ne.s32.totalorder %s3702_s3, %s3228_s10  ;;  %s3233_s28 = sshll.u32 %s3490_s14, 4  ;;  %s3234_s28 = int_to_ptr.vmem [resolvable:$false] %s3233_s28 }
  0x71   : > { %s3235_s22 = scalar_lea.vmem %s3234_s28, 1024  ;;  %p3236_p5 = scmp.lt.s32.totalorder %s3702_s3, %s3234_s28 }
  0x72   : > { %p3231_p6 = pnand %p3229_p2, %p3712_p4  ;;  %p3237_p7 = scmp.lt.s32.totalorder %s3235_s22, %s3228_s10 }
  0x74   : > { %p3232_p11 = pneg %p3231_p6  ;;  %p3238_p9 = por %p3237_p7, %p3236_p5 }
  0x76   : > { %p3239_p1 = pnand %p3238_p9, %p3232_p11 }
  0x78   : > { %3242 = shalt.err (!%p3239_p1)
}
  0x79   : > { %s4611_s21 = smov 128   ;;  %s4615_s17 = smov 8  }
  0x7a   : > { %2737 = dma.hbm_to_vmem [thread:$0]  (!%p3690_p0), %s3699_s27, 512, %s3702_s3, %s3706_s13, %s4611_s21, %s4611_s21, %s4615_s17  }
  0x7b   : > { %s4743_s4 = sld [smem:[#allocation91_spill]]  ;;  %p4744_p7 = scmp.ne.s32.totalorder %s4734_s16, 0 }
  0x81   : > { %s3243_s10 = scalar_lea.hbm %s4743_s4, 256 }
  0x82   : > { %p3244_p5 = scmp.ne.s32.totalorder %s4743_s4, %s3243_s10  ;;  %p3250_p3 = scmp.lt.u32.totalorder %s3243_s10, %s4743_s4 }
  0x84   : > { %p3246_p11 = pnand %p3244_p5, %p4744_p7 }
  0x86   : > { %p3247_p8 = pneg %p3246_p11 }
  0x88   : > { %p3252_p10 = pnand %p3250_p3, %p3247_p8 }
  0x8a   : > { %3255 = shalt.err (!%p3252_p10)
}
  0x8b   : > { %s3256_s6 = scalar_lea.vmem %s367_s5, 256  ;;  %p3264_p6 = scmp.lt.s32.totalorder %s367_s5, %s367_s5 }
  0x8c   : > { %p3257_p12 = scmp.ne.s32.totalorder %s367_s5, %s3256_s6  ;;  %p3265_p9 = scmp.lt.s32.totalorder %s3256_s6, %s3256_s6 }
  0x8e   : > { %p3259_p13 = pnand %p3257_p12, %p4744_p7  ;;  %p3266_p1 = por %p3265_p9, %p3264_p6 }
  0x90   : > { %p3260_p2 = pneg %p3259_p13 }
  0x92   : > { %p3267_p0 = pnand %p3266_p1, %p3260_p2 }
  0x94   : > { %3270 = shalt.err (!%p3267_p0)
}
  0x95   : > { %p4745_p5 = scmp.ne.s32.totalorder %s4732_s29, 0  ;;  %s3493_s1 = smov [#allocation15]  }
  0x96   : > { %s392_s8 = sshll.u32 %s3493_s1, 4  ;;  %s3271_s10 = scalar_lea.hbm %s4592_s7, 2048  ;;  %s393_s8 = int_to_ptr.vmem [resolvable:$true] %s392_s8 }
  0x97   : > { %2721 = dma.hbm_to_vmem [thread:$0]  (!%p4745_p5), %s4743_s4, 256, %s367_s5, [#allocation11]  }
  0x98   : > { %p3272_p11 = scmp.ne.s32.totalorder %s4592_s7, %s3271_s10  ;;  %p3278_p3 = scmp.lt.u32.totalorder %s3271_s10, %s4592_s7 }
  0x9a   : > { %p3274_p0 = pnand %p3272_p11, %p4744_p7 }
  0x9c   : > { %p3275_p8 = pneg %p3274_p0 }
  0x9e   : > { %p3280_p10 = pnand %p3278_p3, %p3275_p8 }
  0xa0   : > { %3283 = shalt.err (!%p3280_p10)
}
  0xa1   : > { %s3284_s5 = scalar_lea.vmem %s393_s8, 2048  ;;  %p3292_p6 = scmp.lt.s32.totalorder %s393_s8, %s393_s8 }
  0xa2   : > { %p3285_p12 = scmp.ne.s32.totalorder %s393_s8, %s3284_s5  ;;  %p3293_p9 = scmp.lt.s32.totalorder %s3284_s5, %s3284_s5 }
  0xa4   : > { %p3287_p13 = pnand %p3285_p12, %p4744_p7  ;;  %p3294_p1 = por %p3293_p9, %p3292_p6 }
  0xa6   : > { %p3288_p2 = pneg %p3287_p13 }
  0xa8   : > { %p3295_p4 = pnand %p3294_p1, %p3288_p2 }
  0xaa   : > { %3298 = shalt.err (!%p3295_p4)
}
  0xab   : > { %s3494_s3 = smov 64   ;;  %s3495_s27 = smov 4  }
  0xac   : > { %2727 = dma.hbm_to_vmem [thread:$0]  (!%p4745_p5), %s4592_s7, 2048, %s393_s8, [#allocation14], %s3494_s3, %s3494_s3, %s3495_s27  }
  0xad   : > { %s3496_s15 = smov [#allocation16]   ;;  %s3780_s22 = scalar_lea.hbm %s4585_s0, %s3685_s26 }
  0xae   : > { %s408_s14 = sshll.u32 %s3496_s15, 4  ;;  %s3299_s17 = scalar_lea.hbm %s4594_s9, 1024  ;;  %s409_s14 = int_to_ptr.vmem [resolvable:$true] %s408_s14 }
  0xaf   : > { %p3300_p4 = scmp.ne.s32.totalorder %s4594_s9, %s3299_s17  ;;  %p3306_p8 = scmp.lt.u32.totalorder %s3299_s17, %s4594_s9 }
  0xb1   : > { %p3302_p11 = pnand %p3300_p4, %p4744_p7 }
  0xb3   : > { %p3303_p0 = pneg %p3302_p11 }
  0xb5   : > { %p3308_p3 = pnand %p3306_p8, %p3303_p0 }
  0xb7   : > { %3311 = shalt.err (!%p3308_p3)
}
  0xb8   : > { %s3312_s1 = scalar_lea.vmem %s409_s14, 1024  ;;  %p3320_p2 = scmp.lt.s32.totalorder %s409_s14, %s409_s14 }
  0xb9   : > { %p3313_p10 = scmp.ne.s32.totalorder %s409_s14, %s3312_s1  ;;  %p3321_p6 = scmp.lt.s32.totalorder %s3312_s1, %s3312_s1 }
  0xbb   : > { %p3315_p12 = pnand %p3313_p10, %p4744_p7  ;;  %p3322_p9 = por %p3321_p6, %p3320_p2 }
  0xbd   : > { %p3316_p13 = pneg %p3315_p12 }
  0xbf   : > { %p3323_p1 = pnand %p3322_p9, %p3316_p13 }
  0xc1   : > { %3326 = shalt.err (!%p3323_p1)
}
  0xc2   : > { %2730 = dma.hbm_to_vmem [thread:$0]  (!%p4745_p5), %s4594_s9, 1024, %s409_s14, [#allocation17], %s3494_s3, %s3494_s3, %s3495_s27  }
  0xc3   : > { %s429_s16 = scalar_lea.vmem [#allocation4], %s3682_s30  ;;  %s3807_s29 = scalar_lea.hbm %s4587_s2, %s3685_s26 }
  0xc4   : > { %s439_s17 = sshll.u32 %s429_s16, 4  ;;  %s4746_s28 = sand.u32 1, %s3471_s19   ;;  %s3801_s17 = int_to_ptr.vmem [resolvable:$true] %s439_s17 }
  0xc5   : > { %s3811_s6 = scalar_lea.sflag [#allocation5], %s4746_s28  ;;  %s3327_s5 = scalar_lea.hbm %s3780_s22, 512 }
  0xc6   : > { %p3328_p7 = scmp.ne.s32.totalorder %s3780_s22, %s3327_s5  ;;  %p4747_p4 = scmp.ne.s32.totalorder %s4742_s12, 0 }
  0xc7   : > { %s3332_s3 = scalar_lea.hbm %s4585_s0, 1024  ;;  %p3333_p5 = scmp.lt.u32.totalorder %s3780_s22, %s4585_s0 }
  0xc8   : > { %p3330_p11 = pnand %p3328_p7, %p4747_p4  ;;  %p3334_p8 = scmp.lt.u32.totalorder %s3332_s3, %s3327_s5 }
  0xc9   : > { %p3336_p10 = scmp.lt.u32.totalorder %s3327_s5, %s3780_s22 }
  0xca   : > { %p3331_p0 = pneg %p3330_p11  ;;  %p3335_p3 = por %p3334_p8, %p3333_p5 }
  0xcc   : > { %p3337_p12 = por %p3336_p10, %p3335_p3 }
  0xce   : > { %p3338_p13 = pnand %p3337_p12, %p3331_p0 }
  0xd0   : > { %3341 = shalt.err (!%p3338_p13)
}
  0xd1   : > { %s3342_s26 = scalar_lea.vmem %s3801_s17, 512  ;;  %s3497_s1 = smov [#allocation4]  }
  0xd2   : > { %p3343_p2 = scmp.ne.s32.totalorder %s3801_s17, %s3342_s26  ;;  %s3347_s4 = sshll.u32 %s3497_s1, 4  ;;  %s3348_s4 = int_to_ptr.vmem [resolvable:$false] %s3347_s4 }
  0xd3   : > { %s3349_s20 = scalar_lea.vmem %s3348_s4, 1024  ;;  %p3350_p1 = scmp.lt.s32.totalorder %s3801_s17, %s3348_s4 }
  0xd4   : > { %p3345_p6 = pnand %p3343_p2, %p4747_p4  ;;  %p3351_p7 = scmp.lt.s32.totalorder %s3349_s20, %s3342_s26 }
  0xd6   : > { %p3346_p9 = pneg %p3345_p6  ;;  %p3352_p11 = por %p3351_p7, %p3350_p1 }
  0xd8   : > { %p3353_p5 = pnand %p3352_p11, %p3346_p9 }
  0xda   : > { %3356 = shalt.err (!%p3353_p5)
}
  0xdb   : > { %p4748_p0 = scmp.ne.s32.totalorder %s4740_s11, 0  ;;  %s4749_s16 = smov 8  }
  0xdc   : > { %s4750_s15 = smov 128   ;;  %s477_s10 = scalar_lea.vmem [#allocation9], %s3682_s30 }
  0xdd   : > { %2734 = dma.hbm_to_vmem [thread:$0]  (!%p4748_p0), %s3780_s22, 512, %s3801_s17, %s3811_s6, %s4750_s15, %s4750_s15, %s4749_s16  }
  0xde   : > { %s487_s28 = sshll.u32 %s477_s10, 4  ;;  %s3357_s5 = scalar_lea.hbm %s3807_s29, 512  ;;  %s3839_s28 = int_to_ptr.vmem [resolvable:$true] %s487_s28 }
  0xdf   : > { %p3358_p8 = scmp.ne.s32.totalorder %s3807_s29, %s3357_s5  ;;  %s3362_s3 = scalar_lea.hbm %s4587_s2, 1024 }
  0xe0   : > { %p3363_p12 = scmp.lt.u32.totalorder %s3807_s29, %s4587_s2  ;;  %p3364_p13 = scmp.lt.u32.totalorder %s3362_s3, %s3357_s5 }
  0xe1   : > { %p3360_p3 = pnand %p3358_p8, %p4747_p4  ;;  %p3366_p6 = scmp.lt.u32.totalorder %s3357_s5, %s3807_s29 }
  0xe2   : > { %p3365_p2 = por %p3364_p13, %p3363_p12 }
  0xe3   : > { %p3361_p10 = pneg %p3360_p3 }
  0xe4   : > { %p3367_p9 = por %p3366_p6, %p3365_p2 }
  0xe6   : > { %p3368_p1 = pnand %p3367_p9, %p3361_p10 }
  0xe8   : > { %3371 = shalt.err (!%p3368_p1)
}
  0xe9   : > { %s3372_s30 = scalar_lea.vmem %s3839_s28, 512  ;;  %s3498_s22 = smov [#allocation9]  }
  0xea   : > { %p3373_p7 = scmp.ne.s32.totalorder %s3839_s28, %s3372_s30  ;;  %s3377_s17 = sshll.u32 %s3498_s22, 4  ;;  %s3378_s17 = int_to_ptr.vmem [resolvable:$false] %s3377_s17 }
  0xeb   : > { %s3379_s6 = scalar_lea.vmem %s3378_s17, 1024  ;;  %p3380_p8 = scmp.lt.s32.totalorder %s3839_s28, %s3378_s17 }
  0xec   : > { %p3375_p11 = pnand %p3373_p7, %p4747_p4  ;;  %p3381_p3 = scmp.lt.s32.totalorder %s3379_s6, %s3372_s30 }
  0xee   : > { %p3376_p5 = pneg %p3375_p11  ;;  %p3382_p12 = por %p3381_p3, %p3380_p8 }
  0xf0   : > { %p3383_p13 = pnand %p3382_p12, %p3376_p5 }
  0xf2   : > { %3386 = shalt.err (!%p3383_p13)
}
  0xf3   : > { %2740 = dma.hbm_to_vmem [thread:$0]  (!%p4748_p0), %s3807_s29, 512, %s3839_s28, %s3706_s13, %s4750_s15, %s4750_s15, %s4749_s16  }
  0xf4   : > { %p4751_p4 = scmp.ne.s32.totalorder %s4731_s24, 0 }
  0xf6   : > { %499 = sbr.rel (%p4751_p4) target bundleno = 2051 (0x803), region = 64 }
  0xfd   : > { %s501_s12 = sand.u32 1, %s3467_s18   ;;  %p4752_p10 = scmp.ne.s32.totalorder %s4738_s25, 0 }
  0xfe   : > { %s2466_s26 = sshll.u32 %s501_s12, 5  ;;  %s502_s1 = scalar_lea.sflag [#allocation5], %s501_s12 }
  0xff   : > { %s3869_s4 = scalar_lea.vmem [#allocation4], %s2466_s26 }
 0x100   : > { %3438 = dma.done.wait (%p4752_p10), %s502_s1, 512  }
 0x101   : > { %3440 = vsyncadd (%p4752_p10), %s502_s1, 4294966784  ;;  %s510_s11 = sand.u32 1, %s3595_s23   ;;  %s3876_s13 = scalar_lea.vmem [#allocation7], %s2466_s26 }
 0x102   : > { %s511_s20 = scalar_lea.sflag [#allocation8], %s510_s11 }
 0x103   : > { %3442 = dma.done.wait (%p4752_p10), %s511_s20, 1024  }
 0x104   : > { %3444 = vsyncadd (%p4752_p10), %s511_s20, 4294966272  ;;  %s3882_s24 = scalar_lea.vmem [#allocation9], %s2466_s26  ;;  %p4753_p0 = scmp.eq.s32.totalorder %s3595_s23, 0 }
 0x106   : > { %3446 = dma.done.wait (%p4753_p0), [#allocation11], 512   ;;  %p4754_p2 = pmov %p4753_p0 }
 0x107   : > { %p4755_p6 = pmov %p4753_p0 }
 0x108   : > { %3448 = vsyncadd (%p4754_p2), [#allocation11], 4294966784 }
 0x109   : > { %3450 = dma.done.wait (%p4755_p6), [#allocation14], 14336   ;;  %p4756_p9 = pmov %p4753_p0 }
 0x10a   : > { %p4757_p1 = pmov %p4753_p0 }
 0x10b   : > { %3452 = vsyncadd (%p4756_p9), [#allocation14], 4294952960 }
 0x10c   : > { %3454 = dma.done.wait (%p4757_p1), [#allocation17], 1024   ;;  %p4758_p7 = pmov %p4753_p0 }
 0x10d   : > { %s4759_s25 = sld [smem:[#allocation25_spill]] }
 0x10e   : > { %3456 = vsyncadd (%p4758_p7), [#allocation17], 4294966272 }
 0x113   : > { %p2474_p11 = scmp.ne.s32.totalorder %s4759_s25, 0 }
 0x114   : > { %v3499_v0 = vmov (!%p2474_p11), 0.0   ;;  %v3500_v1 = vmov (!%p2474_p11), -1e+30  }
 0x115   : > { %594 = sbr.rel (%p2474_p11) target bundleno = 284 (0x11c), region = 100  ;;  %595 = vst [vmem:[#allocation2] sm:$0xff] (!%p2474_p11), %v3499_v0  ;;  %596 = vst [vmem:[#allocation2 + $0x8] sm:$0xff] (!%p2474_p11), %v3499_v0 }
 0x116   : > { %597 = vst [vmem:[#allocation3] sm:$0xff] (!%p2474_p11), %v3500_v1  ;;  %598 = vst [vmem:[#allocation3 + $0x8] sm:$0xff] (!%p2474_p11), %v3500_v1 }
 0x11c PF: > { %v3897_v2 = vld [vmem:[#allocation13 + $0x4] ss:$24 sps:$4 sm:$0xff]   ;;  %v3899_v3 = vld [vmem:[#allocation13] ss:$24 sps:$4 sm:$0xff]   ;;  %v3902_v4 = vld [vmem:[#allocation13 + $0x34] ss:$24 sps:$4 sm:$0xff]  }
 0x11d   : > { %1214 = vmatprep.subr.bf16.mxu0 %v3897_v2  ;;  %v3905_v5 = vld [vmem:[#allocation13 + $0x30] ss:$24 sps:$4 sm:$0xff]   ;;  %v3908_v6 = vld [vmem:[#allocation13 + $0x64] ss:$24 sps:$4 sm:$0xff]   ;;  %v3911_v7 = vld [vmem:[#allocation13 + $0x60] ss:$24 sps:$4 sm:$0xff]  }
 0x11e   : > { %1215 = vmatpush1.bf16.msra.mxu0 %v3899_v3  ;;  %v3914_v8 = vld [vmem:[#allocation13 + $0x94] ss:$24 sps:$4 sm:$0xff]   ;;  %v3917_v9 = vld [vmem:[#allocation13 + $0x90] ss:$24 sps:$4 sm:$0xff]   ;;  %v3920_v10 = vld [vmem:[#allocation13 + $0xc4] ss:$24 sps:$4 sm:$0xff]  }
 0x11f   : > { %1216 = vmatprep.subr.bf16.mxu0 %v3902_v4  ;;  %v3923_v11 = vld [vmem:[#allocation13 + $0xc0] ss:$24 sps:$4 sm:$0xff]   ;;  %v3926_v12 = vld [vmem:[#allocation13 + $0xf4] ss:$24 sps:$4 sm:$0xff]   ;;  %v3933_v15 = vld [vmem:[#allocation13 + $0xf0] ss:$24 sps:$4 sm:$0xff]  }
 0x120   : > { %v3928_v13 = vld [vmem:[#allocation13 + $0xc] ss:$24 sps:$4 sm:$0xff]   ;;  %v3930_v14 = vld [vmem:[#allocation13 + $0x8] ss:$24 sps:$4 sm:$0xff]   ;;  %v3940_v17 = vld [vmem:[#allocation13 + $0x3c] ss:$24 sps:$4 sm:$0xff]  }
 0x121   : > { %1255 = vmatprep.subr.bf16.mxu1 %v3928_v13  ;;  %v3937_v16 = vld [vmem:[#allocation13 + $0x124] ss:$24 sps:$4 sm:$0xff]   ;;  %v3942_v18 = vld [vmem:[#allocation13 + $0x38] ss:$24 sps:$4 sm:$0xff]   ;;  %v3948_v20 = vld [vmem:[#allocation13 + $0x154] ss:$24 sps:$4 sm:$0xff]  }
 0x122   : > { %1217 = vmatpush1.bf16.msra.mxu0 %v3905_v5  ;;  %1256 = vmatpush1.bf16.msra.mxu1 %v3930_v14  ;;  %v3946_v19 = vld [vmem:[#allocation13 + $0x120] ss:$24 sps:$4 sm:$0xff]   ;;  %v3950_v21 = vld [vmem:[#allocation13 + $0x6c] ss:$24 sps:$4 sm:$0xff]   ;;  %v3957_v23 = vld [vmem:[#allocation13 + $0x9c] ss:$24 sps:$4 sm:$0xff]  }
 0x123   : > { %1218 = vmatprep.subr.bf16.mxu0 %v3908_v6  ;;  %1257 = vmatprep.subr.bf16.mxu1 %v3940_v17  ;;  %v3954_v22 = vld [vmem:[#allocation13 + $0x68] ss:$24 sps:$4 sm:$0xff]   ;;  %4761 = vst [vmem:[#allocation31_spill] sm:$0xff] %v3957_v23  ;;  %v3964_v26 = vld [vmem:[#allocation13 + $0x184] ss:$24 sps:$4 sm:$0xff]   ;;  %s4822_s15 = sld [smem:[#allocation93_spill]] }
 0x124   : > { %4760 = vst [vmem:[#allocation30_spill] sm:$0xff] %v3954_v22  ;;  %v3959_v24 = vld [vmem:[#allocation13 + $0x150] ss:$24 sps:$4 sm:$0xff]   ;;  %v3976_v29 = vld [vmem:[#allocation13 + $0xcc] ss:$24 sps:$4 sm:$0xff]   ;;  %s4825_s10 = sld [smem:[#allocation25_spill]] }
 0x125   : > { %v3961_v25 = vld [vmem:[#allocation2 + $0x8] sm:$0xff]  ;;  %v3972_v28 = vld [vmem:[#allocation13 + $0x98] ss:$24 sps:$4 sm:$0xff]   ;;  %4764 = vst [vmem:[#allocation34_spill] sm:$0xff] %v3976_v29  ;;  %v3989_v33 = vld [vmem:[#allocation13 + $0xfc] ss:$24 sps:$4 sm:$0xff]  }
 0x126   : > { %1219 = vmatpush1.bf16.msra.mxu0 %v3911_v7  ;;  %1258 = vmatpush1.bf16.msra.mxu1 %v3942_v18  ;;  %4762 = vst [vmem:[#allocation32_spill] sm:$0xff] %v3961_v25  ;;  %v3968_v27 = vpack.c.bf16 %v3961_v25, %v3961_v25  ;;  %4763 = vst [vmem:[#allocation33_spill] sm:$0xff] %v3972_v28  ;;  %v3980_v30 = vld [vmem:[#allocation13 + $0x180] ss:$24 sps:$4 sm:$0xff]   ;;  %v3983_v31 = vld [vmem:[#allocation13 + $0x1b4] ss:$24 sps:$4 sm:$0xff]  }
 0x127   : > { %1220 = vmatprep.subr.bf16.mxu0 %v3914_v8  ;;  %1259 = vmatprep.subr.bf16.mxu1 %v3950_v21  ;;  %v3986_v32 = vld [vmem:[#allocation13 + $0xc8] ss:$24 sps:$4 sm:$0xff]   ;;  %4766 = vst [vmem:[#allocation36_spill] sm:$0xff] %v3989_v33  ;;  %v3994_v35 = vld [vmem:[#allocation13 + $0x1e4] ss:$24 sps:$4 sm:$0xff]  }
 0x128   : > { %1246 = vmatprep.mubr.bf16.mxu0 %v3968_v27  ;;  %1287 = vmatprep.mubr.bf16.mxu1 %v3968_v27  ;;  %4765 = vst [vmem:[#allocation35_spill] sm:$0xff] %v3986_v32  ;;  %v3991_v34 = vld [vmem:[#allocation13 + $0x1b0] ss:$24 sps:$4 sm:$0xff]   ;;  %v4001_v37 = vld [vmem:[#allocation13 + $0x12c] ss:$24 sps:$4 sm:$0xff]  }
 0x129   : > { %v3998_v36 = vld [vmem:[#allocation13 + $0xf8] ss:$24 sps:$4 sm:$0xff]   ;;  %4768 = vst [vmem:[#allocation38_spill] sm:$0xff] %v4001_v37  ;;  %v4007_v39 = vld [vmem:[#allocation13 + $0x214] ss:$24 sps:$4 sm:$0xff]   ;;  %v4066_v59 = vld [vmem:[#allocation2] sm:$0xff] }
 0x12a   : > { %1221 = vmatpush1.bf16.msra.mxu0 %v3917_v9  ;;  %1260 = vmatpush1.bf16.msra.mxu1 %v3954_v22  ;;  %4767 = vst [vmem:[#allocation37_spill] sm:$0xff] %v3998_v36  ;;  %v4004_v38 = vld [vmem:[#allocation13 + $0x1e0] ss:$24 sps:$4 sm:$0xff]   ;;  %v4013_v41 = vld [vmem:[#allocation13 + $0x15c] ss:$24 sps:$4 sm:$0xff]   ;;  %4779 = vst [vmem:[#allocation49_spill] sm:$0xff] %v4066_v59  ;;  %v4079_v63 = vpack.c.bf16 %v4066_v59, %v4066_v59 }
 0x12b   : > { %1222 = vmatprep.subr.bf16.mxu0 %v3920_v10  ;;  %1261 = vmatprep.subr.bf16.mxu1 %v3957_v23  ;;  %v4010_v40 = vld [vmem:[#allocation13 + $0x128] ss:$24 sps:$4 sm:$0xff]   ;;  %4770 = vst [vmem:[#allocation40_spill] sm:$0xff] %v4013_v41  ;;  %v4018_v43 = vld [vmem:[#allocation13 + $0x244] ss:$24 sps:$4 sm:$0xff]   ;;  %s4282_s28 = sshll.u32 %s4825_s10, 2 }
 0x12c   : > { %4769 = vst [vmem:[#allocation39_spill] sm:$0xff] %v4010_v40  ;;  %v4015_v42 = vld [vmem:[#allocation13 + $0x210] ss:$24 sps:$4 sm:$0xff]   ;;  %v4025_v45 = vld [vmem:[#allocation13 + $0x18c] ss:$24 sps:$4 sm:$0xff]   ;;  %s1399_s5 = sadd.s32 1, %s4282_s28 }
 0x12d   : > { %v4022_v44 = vld [vmem:[#allocation13 + $0x158] ss:$24 sps:$4 sm:$0xff]   ;;  %4772 = vst [vmem:[#allocation42_spill] sm:$0xff] %v4025_v45  ;;  %v4031_v47 = vld [vmem:[#allocation13 + $0x274] ss:$24 sps:$4 sm:$0xff]   ;;  %s1594_s8 = sadd.s32 2, %s4282_s28 }
 0x12e   : > { %1223 = vmatpush1.bf16.msra.mxu0 %v3923_v11  ;;  %1262 = vmatpush1.bf16.msra.mxu1 %v3972_v28  ;;  %4771 = vst [vmem:[#allocation41_spill] sm:$0xff] %v4022_v44  ;;  %v4028_v46 = vld [vmem:[#allocation13 + $0x240] ss:$24 sps:$4 sm:$0xff]   ;;  %v4037_v49 = vld [vmem:[#allocation13 + $0x1bc] ss:$24 sps:$4 sm:$0xff]   ;;  %s1789_s21 = sadd.s32 3, %s4282_s28 }
 0x12f   : > { %1224 = vmatprep.subr.bf16.mxu0 %v3926_v12  ;;  %1263 = vmatprep.subr.bf16.mxu1 %v3976_v29  ;;  %v4034_v48 = vld [vmem:[#allocation13 + $0x188] ss:$24 sps:$4 sm:$0xff]   ;;  %4774 = vst [vmem:[#allocation44_spill] sm:$0xff] %v4037_v49  ;;  %v4042_v51 = vld [vmem:[#allocation13 + $0x2a4] ss:$24 sps:$4 sm:$0xff]   ;;  %p2597_p5 = scmp.ne.s32.totalorder %s4825_s10, 1 }
 0x130   : > { %4773 = vst [vmem:[#allocation43_spill] sm:$0xff] %v4034_v48  ;;  %v4039_v50 = vld [vmem:[#allocation13 + $0x270] ss:$24 sps:$4 sm:$0xff]   ;;  %v4049_v53 = vld [vmem:[#allocation13 + $0x1ec] ss:$24 sps:$4 sm:$0xff]   ;;  %s4888_s14 = sld [smem:[#allocation94_spill]] (!%p2597_p5) }
 0x131   : > { %v4046_v52 = vld [vmem:[#allocation13 + $0x1b8] ss:$24 sps:$4 sm:$0xff]   ;;  %4776 = vst [vmem:[#allocation46_spill] sm:$0xff] %v4049_v53  ;;  %v4055_v55 = vld [vmem:[#allocation13 + $0x2d4] ss:$24 sps:$4 sm:$0xff]   ;;  %s4889_s17 = sld [smem:[#allocation95_spill]] (!%p2597_p5) }
 0x132   : > { %1225 = vmatpush1.bf16.msra.mxu0 %v3933_v15  ;;  %1264 = vmatpush1.bf16.msra.mxu1 %v3986_v32  ;;  %4775 = vst [vmem:[#allocation45_spill] sm:$0xff] %v4046_v52  ;;  %v4052_v54 = vld [vmem:[#allocation13 + $0x2a0] ss:$24 sps:$4 sm:$0xff]   ;;  %v4061_v57 = vld [vmem:[#allocation13 + $0x21c] ss:$24 sps:$4 sm:$0xff]  }
 0x133   : > { %1226 = vmatprep.subr.bf16.mxu0 %v3937_v16  ;;  %1265 = vmatprep.subr.bf16.mxu1 %v3989_v33  ;;  %v4058_v56 = vld [vmem:[#allocation13 + $0x1e8] ss:$24 sps:$4 sm:$0xff]   ;;  %4778 = vst [vmem:[#allocation48_spill] sm:$0xff] %v4061_v57  ;;  %v4069_v60 = vld [vmem:[#allocation13 + $0x14] ss:$24 sps:$4 sm:$0xff]  }
 0x134   : > { %4777 = vst [vmem:[#allocation47_spill] sm:$0xff] %v4058_v56  ;;  %v4063_v58 = vld [vmem:[#allocation13 + $0x2d0] ss:$24 sps:$4 sm:$0xff]   ;;  %v4075_v62 = vld [vmem:[#allocation13 + $0x24c] ss:$24 sps:$4 sm:$0xff]  }
 0x135   : > { %v4072_v61 = vld [vmem:[#allocation13 + $0x218] ss:$24 sps:$4 sm:$0xff]   ;;  %4781 = vst [vmem:[#allocation51_spill] sm:$0xff] %v4075_v62  ;;  %v4085_v1 = vld [vmem:[#allocation13 + $0x44] ss:$24 sps:$4 sm:$0xff]  }
 0x136   : > { %1227 = vmatpush1.bf16.msra.mxu0 %v3946_v19  ;;  %1266 = vmatpush1.bf16.msra.mxu1 %v3998_v36  ;;  %4780 = vst [vmem:[#allocation50_spill] sm:$0xff] %v4072_v61  ;;  %v4082_v0 = vld [vmem:[#allocation13 + $0x10] ss:$24 sps:$4 sm:$0xff]   ;;  %4783 = vst [vmem:[#allocation53_spill] sm:$0xff] %v4085_v1  ;;  %v4095_v59 = vld [vmem:[#allocation13 + $0x40] ss:$24 sps:$4 sm:$0xff]  }
 0x137   : > { %1228 = vmatprep.subr.bf16.mxu0 %v3948_v20  ;;  %1267 = vmatprep.subr.bf16.mxu1 %v4001_v37  ;;  %4782 = vst [vmem:[#allocation52_spill] sm:$0xff] %v4082_v0  ;;  %v4088_v25 = vld [vmem:[#allocation13 + $0x248] ss:$24 sps:$4 sm:$0xff]   ;;  %4786 = vst [vmem:[#allocation56_spill] sm:$0xff] %v4095_v59 }
 0x138   : > { %4784 = vst [vmem:[#allocation54_spill] sm:$0xff] %v4088_v25 }
 0x13a   : > { %1229 = vmatpush1.bf16.msra.mxu0 %v3959_v24  ;;  %1268 = vmatpush1.bf16.msra.mxu1 %v4010_v40 }
 0x13b   : > { %1230 = vmatprep.subr.bf16.mxu0 %v3964_v26  ;;  %1269 = vmatprep.subr.bf16.mxu1 %v4013_v41 }
 0x13e   : > { %1231 = vmatpush1.bf16.msra.mxu0 %v3980_v30  ;;  %1270 = vmatpush1.bf16.msra.mxu1 %v4022_v44 }
 0x13f   : > { %1232 = vmatprep.subr.bf16.mxu0 %v3983_v31  ;;  %1271 = vmatprep.subr.bf16.mxu1 %v4025_v45 }
 0x142   : > { %1233 = vmatpush1.bf16.msra.mxu0 %v3991_v34  ;;  %1272 = vmatpush1.bf16.msra.mxu1 %v4034_v48 }
 0x143   : > { %1234 = vmatprep.subr.bf16.mxu0 %v3994_v35  ;;  %1273 = vmatprep.subr.bf16.mxu1 %v4037_v49 }
 0x146   : > { %1235 = vmatpush1.bf16.msra.mxu0 %v4004_v38  ;;  %1274 = vmatpush1.bf16.msra.mxu1 %v4046_v52 }
 0x147   : > { %1236 = vmatprep.subr.bf16.mxu0 %v4007_v39  ;;  %1275 = vmatprep.subr.bf16.mxu1 %v4049_v53  ;;  %v4108_v53 = vld [vmem:[#allocation13 + $0x70] ss:$24 sps:$4 sm:$0xff]  }
 0x148   : > { %4790 = vst [vmem:[#allocation60_spill] sm:$0xff] %v4108_v53 }
 0x14a   : > { %1237 = vmatpush1.bf16.msra.mxu0 %v4015_v42  ;;  %1276 = vmatpush1.bf16.msra.mxu1 %v4058_v56  ;;  %v4099_v56 = vld [vmem:[#allocation13 + $0x74] ss:$24 sps:$4 sm:$0xff]  }
 0x14b   : > { %1238 = vmatprep.subr.bf16.mxu0 %v4018_v43  ;;  %1277 = vmatprep.subr.bf16.mxu1 %v4061_v57  ;;  %v4091_v57 = vld [vmem:[#allocation13 + $0x27c] ss:$24 sps:$4 sm:$0xff]   ;;  %4787 = vst [vmem:[#allocation57_spill] sm:$0xff] %v4099_v56 }
 0x14c   : > { %4785 = vst [vmem:[#allocation55_spill] sm:$0xff] %v4091_v57 }
 0x14e   : > { %1239 = vmatpush1.bf16.msra.mxu0 %v4028_v46  ;;  %1278 = vmatpush1.bf16.msra.mxu1 %v4072_v61  ;;  %v4102_v61 = vld [vmem:[#allocation13 + $0x278] ss:$24 sps:$4 sm:$0xff]  }
 0x14f   : > { %1240 = vmatprep.subr.bf16.mxu0 %v4031_v47  ;;  %1279 = vmatprep.subr.bf16.mxu1 %v4075_v62  ;;  %4788 = vst [vmem:[#allocation58_spill] sm:$0xff] %v4102_v61  ;;  %v4105_v62 = vld [vmem:[#allocation13 + $0x2ac] ss:$24 sps:$4 sm:$0xff]  }
 0x150   : > { %4789 = vst [vmem:[#allocation59_spill] sm:$0xff] %v4105_v62 }
 0x152   : > { %1241 = vmatpush1.bf16.msra.mxu0 %v4039_v50  ;;  %1280 = vmatpush1.bf16.msra.mxu1 %v4088_v25 }
 0x153   : > { %1242 = vmatprep.subr.bf16.mxu0 %v4042_v51  ;;  %1281 = vmatprep.subr.bf16.mxu1 %v4091_v57  ;;  %v4120_v57 = vld [vmem:[#allocation13 + $0xa0] ss:$24 sps:$4 sm:$0xff]  }
 0x154   : > { %4794 = vst [vmem:[#allocation64_spill] sm:$0xff] %v4120_v57 }
 0x156   : > { %1243 = vmatpush1.bf16.msra.mxu0 %v4052_v54  ;;  %1282 = vmatpush1.bf16.msra.mxu1 %v4102_v61  ;;  %v4130_v61 = vld [vmem:[#allocation13 + $0xd0] ss:$24 sps:$4 sm:$0xff]  }
 0x157   : > { %1244 = vmatprep.subr.bf16.mxu0 %v4055_v55  ;;  %1283 = vmatprep.subr.bf16.mxu1 %v4105_v62  ;;  %4797 = vst [vmem:[#allocation67_spill] sm:$0xff] %v4130_v61  ;;  %v4133_v62 = vld [vmem:[#allocation13 + $0x104] ss:$24 sps:$4 sm:$0xff]  }
 0x158   : > { %4798 = vst [vmem:[#allocation68_spill] sm:$0xff] %v4133_v62 }
 0x15a   : > { %1245 = vmatpush1.bf16.msra.mxu0 %v4063_v58 }
 0x15b   : > { %1296 = vmatprep.subr.bf16.mxu0 %v4069_v60 }
 0x15d   : > { %1247 = vmatmul.mubr.bf16.vlgmr.msra.gmra.mrb[0].mxu0 %v4079_v63 }
 0x15e   : > { %1297 = vmatpush1.bf16.msra.mxu0 %v4082_v0  ;;  %1328 = vmatprep.mubr.bf16.mxu0 %v3968_v27  ;;  %v4111_v0 = vld [vmem:[#allocation13 + $0xa4] ss:$24 sps:$4 sm:$0xff]   ;;  %v4114_v27 = vld [vmem:[#allocation13 + $0x2a8] ss:$24 sps:$4 sm:$0xff]  }
 0x15f   : > { %1298 = vmatprep.subr.bf16.mxu0 %v4085_v1  ;;  %4791 = vst [vmem:[#allocation61_spill] sm:$0xff] %v4111_v0  ;;  %4792 = vst [vmem:[#allocation62_spill] sm:$0xff] %v4114_v27  ;;  %v4117_v1 = vld [vmem:[#allocation13 + $0x2dc] ss:$24 sps:$4 sm:$0xff]   ;;  %1284 = vmatpush1.bf16.msra.mxu1 %v4114_v27 }
 0x160   : > { %4793 = vst [vmem:[#allocation63_spill] sm:$0xff] %v4117_v1  ;;  %1285 = vmatprep.subr.bf16.mxu1 %v4117_v1 }
 0x162   : > { %1299 = vmatpush1.bf16.msra.mxu0 %v4095_v59  ;;  %v4123_v59 = vld [vmem:[#allocation13 + $0xd4] ss:$24 sps:$4 sm:$0xff]  }
 0x163   : > { %1300 = vmatprep.subr.bf16.mxu0 %v4099_v56  ;;  %4795 = vst [vmem:[#allocation65_spill] sm:$0xff] %v4123_v59  ;;  %v4126_v56 = vld [vmem:[#allocation13 + $0x2d8] ss:$24 sps:$4 sm:$0xff]  }
 0x164   : > { %4796 = vst [vmem:[#allocation66_spill] sm:$0xff] %v4126_v56  ;;  %1286 = vmatpush1.bf16.msra.mxu1 %v4126_v56 }
 0x165   : > { %1409 = vmatprep.subr.bf16.mxu1 %v3897_v2 }
 0x166   : > { %1301 = vmatpush1.bf16.msra.mxu0 %v4108_v53  ;;  %v4142_v53 = vld [vmem:[#allocation13 + $0x134] ss:$24 sps:$4 sm:$0xff]  }
 0x167   : > { %1302 = vmatprep.subr.bf16.mxu0 %v4111_v0  ;;  %v4138_v0 = vld [vmem:[#allocation13 + $0x100] ss:$24 sps:$4 sm:$0xff]   ;;  %1288 = vmatmul.mubr.bf16.vlgmr.msra.gmra.mrb[0].mxu1 %v4079_v63  ;;  %4800 = vst [vmem:[#allocation70_spill] sm:$0xff] %v4142_v53 }
 0x168   : > { %4799 = vst [vmem:[#allocation69_spill] sm:$0xff] %v4138_v0  ;;  %1410 = vmatpush1.bf16.msra.mxu1 %v3899_v3 }
 0x169   : > { %1411 = vmatprep.subr.bf16.mxu1 %v3902_v4 }
 0x16a   : > { %1303 = vmatpush1.bf16.msra.mxu0 %v4120_v57  ;;  %v4150_v57 = vld [vmem:[#allocation13 + $0x164] ss:$24 sps:$4 sm:$0xff]  }
 0x16b   : > { %1304 = vmatprep.subr.bf16.mxu0 %v4123_v59  ;;  %v4147_v59 = vld [vmem:[#allocation13 + $0x130] ss:$24 sps:$4 sm:$0xff]   ;;  %4802 = vst [vmem:[#allocation72_spill] sm:$0xff] %v4150_v57 }
 0x16c   : > { %4801 = vst [vmem:[#allocation71_spill] sm:$0xff] %v4147_v59  ;;  %1412 = vmatpush1.bf16.msra.mxu1 %v3905_v5 }
 0x16d   : > { %1413 = vmatprep.subr.bf16.mxu1 %v3908_v6 }
 0x16e   : > { %1305 = vmatpush1.bf16.msra.mxu0 %v4130_v61  ;;  %v4158_v61 = vld [vmem:[#allocation13 + $0x194] ss:$24 sps:$4 sm:$0xff]  }
 0x16f   : > { %1306 = vmatprep.subr.bf16.mxu0 %v4133_v62  ;;  %v4155_v62 = vld [vmem:[#allocation13 + $0x160] ss:$24 sps:$4 sm:$0xff]   ;;  %4804 = vst [vmem:[#allocation74_spill] sm:$0xff] %v4158_v61 }
 0x170   : > { %4803 = vst [vmem:[#allocation73_spill] sm:$0xff] %v4155_v62  ;;  %1414 = vmatpush1.bf16.msra.mxu1 %v3911_v7 }
 0x171   : > { %1415 = vmatprep.subr.bf16.mxu1 %v3914_v8 }
 0x172   : > { %1307 = vmatpush1.bf16.msra.mxu0 %v4138_v0  ;;  %v4166_v0 = vld [vmem:[#allocation13 + $0x1c4] ss:$24 sps:$4 sm:$0xff]  }
 0x173   : > { %1308 = vmatprep.subr.bf16.mxu0 %v4142_v53  ;;  %v4163_v53 = vld [vmem:[#allocation13 + $0x190] ss:$24 sps:$4 sm:$0xff]   ;;  %4806 = vst [vmem:[#allocation76_spill] sm:$0xff] %v4166_v0 }
 0x174   : > { %4805 = vst [vmem:[#allocation75_spill] sm:$0xff] %v4163_v53  ;;  %1416 = vmatpush1.bf16.msra.mxu1 %v3917_v9 }
 0x175   : > { %1417 = vmatprep.subr.bf16.mxu1 %v3920_v10 }
 0x176   : > { %1309 = vmatpush1.bf16.msra.mxu0 %v4147_v59  ;;  %v4174_v59 = vld [vmem:[#allocation13 + $0x1f4] ss:$24 sps:$4 sm:$0xff]  }
 0x177   : > { %1310 = vmatprep.subr.bf16.mxu0 %v4150_v57  ;;  %v4171_v57 = vld [vmem:[#allocation13 + $0x1c0] ss:$24 sps:$4 sm:$0xff]   ;;  %4808 = vst [vmem:[#allocation78_spill] sm:$0xff] %v4174_v59 }
 0x178   : > { %4807 = vst [vmem:[#allocation77_spill] sm:$0xff] %v4171_v57  ;;  %1418 = vmatpush1.bf16.msra.mxu1 %v3923_v11 }
 0x179   : > { %1419 = vmatprep.subr.bf16.mxu1 %v3926_v12 }
 0x17a   : > { %1311 = vmatpush1.bf16.msra.mxu0 %v4155_v62  ;;  %v4182_v62 = vld [vmem:[#allocation13 + $0x224] ss:$24 sps:$4 sm:$0xff]  }
 0x17b   : > { %1312 = vmatprep.subr.bf16.mxu0 %v4158_v61  ;;  %v4179_v61 = vld [vmem:[#allocation13 + $0x1f0] ss:$24 sps:$4 sm:$0xff]   ;;  %4810 = vst [vmem:[#allocation80_spill] sm:$0xff] %v4182_v62 }
 0x17c   : > { %4809 = vst [vmem:[#allocation79_spill] sm:$0xff] %v4179_v61  ;;  %1420 = vmatpush1.bf16.msra.mxu1 %v3933_v15 }
 0x17d   : > { %1421 = vmatprep.subr.bf16.mxu1 %v3937_v16 }
 0x17e   : > { %1313 = vmatpush1.bf16.msra.mxu0 %v4163_v53  ;;  %v4190_v53 = vld [vmem:[#allocation13 + $0x254] ss:$24 sps:$4 sm:$0xff]  }
 0x17f   : > { %1314 = vmatprep.subr.bf16.mxu0 %v4166_v0  ;;  %v4187_v0 = vld [vmem:[#allocation13 + $0x220] ss:$24 sps:$4 sm:$0xff]   ;;  %4812 = vst [vmem:[#allocation82_spill] sm:$0xff] %v4190_v53 }
 0x180   : > { %4811 = vst [vmem:[#allocation81_spill] sm:$0xff] %v4187_v0  ;;  %1422 = vmatpush1.bf16.msra.mxu1 %v3946_v19 }
 0x181   : > { %1423 = vmatprep.subr.bf16.mxu1 %v3948_v20 }
 0x182   : > { %1315 = vmatpush1.bf16.msra.mxu0 %v4171_v57  ;;  %v4198_v57 = vld [vmem:[#allocation13 + $0x284] ss:$24 sps:$4 sm:$0xff]  }
 0x183   : > { %1316 = vmatprep.subr.bf16.mxu0 %v4174_v59  ;;  %v4195_v59 = vld [vmem:[#allocation13 + $0x250] ss:$24 sps:$4 sm:$0xff]   ;;  %4813 = vst [vmem:[#allocation83_spill] sm:$0xff] %v4198_v57 }
 0x184   : > { %1424 = vmatpush1.bf16.msra.mxu1 %v3959_v24 }
 0x185   : > { %1425 = vmatprep.subr.bf16.mxu1 %v3964_v26 }
 0x186   : > { %1317 = vmatpush1.bf16.msra.mxu0 %v4179_v61  ;;  %v4206_v61 = vld [vmem:[#allocation13 + $0x2b4] ss:$24 sps:$4 sm:$0xff]  }
 0x187   : > { %1318 = vmatprep.subr.bf16.mxu0 %v4182_v62  ;;  %v4203_v62 = vld [vmem:[#allocation13 + $0x280] ss:$24 sps:$4 sm:$0xff]  }
 0x188   : > { %1426 = vmatpush1.bf16.msra.mxu1 %v3980_v30 }
 0x189   : > { %1427 = vmatprep.subr.bf16.mxu1 %v3983_v31 }
 0x18a   : > { %1319 = vmatpush1.bf16.msra.mxu0 %v4187_v0  ;;  %v4214_v0 = vld [vmem:[#allocation13 + $0x2e4] ss:$24 sps:$4 sm:$0xff]  }
 0x18b   : > { %1320 = vmatprep.subr.bf16.mxu0 %v4190_v53  ;;  %v4211_v53 = vld [vmem:[#allocation13 + $0x2b0] ss:$24 sps:$4 sm:$0xff]  }
 0x18c   : > { %1428 = vmatpush1.bf16.msra.mxu1 %v3991_v34 }
 0x18d   : > { %1429 = vmatprep.subr.bf16.mxu1 %v3994_v35 }
 0x18e   : > { %1321 = vmatpush1.bf16.msra.mxu0 %v4195_v59 }
 0x18f   : > { %1322 = vmatprep.subr.bf16.mxu0 %v4198_v57  ;;  %v4219_v57 = vld [vmem:[#allocation13 + $0x2e0] ss:$24 sps:$4 sm:$0xff]  }
 0x190   : > { %1430 = vmatpush1.bf16.msra.mxu1 %v4004_v38 }
 0x191   : > { %1431 = vmatprep.subr.bf16.mxu1 %v4007_v39 }
 0x192   : > { %1323 = vmatpush1.bf16.msra.mxu0 %v4203_v62 }
 0x193   : > { %1324 = vmatprep.subr.bf16.mxu0 %v4206_v61 }
 0x194   : > { %1432 = vmatpush1.bf16.msra.mxu1 %v4015_v42 }
 0x195   : > { %1433 = vmatprep.subr.bf16.mxu1 %v4018_v43 }
 0x196   : > { %1325 = vmatpush1.bf16.msra.mxu0 %v4211_v53 }
 0x197   : > { %1326 = vmatprep.subr.bf16.mxu0 %v4214_v0 }
 0x198   : > { %1434 = vmatpush1.bf16.msra.mxu1 %v4028_v46 }
 0x199   : > { %1435 = vmatprep.subr.bf16.mxu1 %v4031_v47 }
 0x19a   : > { %1327 = vmatpush1.bf16.msra.mxu0 %v4219_v57 }
 0x19b   : > { %1450 = vmatprep.subr.bf16.mxu0 %v3928_v13 }
 0x19c   : > { %1436 = vmatpush1.bf16.msra.mxu1 %v4039_v50 }
 0x19d   : > { %1329 = vmatmul.mubr.bf16.vlgmr.msra.gmra.mrb[4].mxu0 %v4079_v63  ;;  %1437 = vmatprep.subr.bf16.mxu1 %v4042_v51  ;;  %v4814_v63 = vld [vmem:[#allocation46_spill] sm:$0xff] }
 0x19e   : > { %1451 = vmatpush1.bf16.msra.mxu0 %v3930_v14 }
 0x19f   : > { %1452 = vmatprep.subr.bf16.mxu0 %v3940_v17 }
 0x1a0   : > { %1438 = vmatpush1.bf16.msra.mxu1 %v4052_v54 }
 0x1a1   : > { %1439 = vmatprep.subr.bf16.mxu1 %v4055_v55 }
 0x1a2   : > { %1453 = vmatpush1.bf16.msra.mxu0 %v3942_v18 }
 0x1a3   : > { %1454 = vmatprep.subr.bf16.mxu0 %v3950_v21 }
 0x1a4   : > { %1440 = vmatpush1.bf16.msra.mxu1 %v4063_v58 }
 0x1a5   : > { %1491 = vmatprep.subr.bf16.mxu1 %v4069_v60 }
 0x1a6   : > { %1455 = vmatpush1.bf16.msra.mxu0 %v3954_v22 }
 0x1a7   : > { %1456 = vmatprep.subr.bf16.mxu0 %v3957_v23 }
 0x1aa   : > { %1457 = vmatpush1.bf16.msra.mxu0 %v3972_v28 }
 0x1ab   : > { %1458 = vmatprep.subr.bf16.mxu0 %v3976_v29 }
 0x1ae   : > { %1459 = vmatpush1.bf16.msra.mxu0 %v3986_v32  ;;  %v719_v32 = vld [vmem:[%s3876_s13] sm:$0xff] }
 0x1af   : > { %1460 = vmatprep.subr.bf16.mxu0 %v3989_v33  ;;  %v4815_v33 = vld [vmem:[#allocation47_spill] sm:$0xff]  ;;  %v720_v28 = vunpack.c.l.bf16 %v719_v32 }
 0x1b2   : > { %1461 = vmatpush1.bf16.msra.mxu0 %v3998_v36  ;;  %v4816_v36 = vld [vmem:[#allocation48_spill] sm:$0xff] }
 0x1b3   : > { %1462 = vmatprep.subr.bf16.mxu0 %v4001_v37  ;;  %v4817_v37 = vld [vmem:[#allocation50_spill] sm:$0xff] }
 0x1b6   : > { %1463 = vmatpush1.bf16.msra.mxu0 %v4010_v40  ;;  %v4818_v40 = vld [vmem:[#allocation51_spill] sm:$0xff] }
 0x1b7   : > { %1464 = vmatprep.subr.bf16.mxu0 %v4013_v41 }
 0x1ba   : > { %1465 = vmatpush1.bf16.msra.mxu0 %v4022_v44  ;;  %v4819_v44 = vld [vmem:[#allocation55_spill] sm:$0xff] }
 0x1bb   : > { %1466 = vmatprep.subr.bf16.mxu0 %v4025_v45 }
 0x1be   : > { %1467 = vmatpush1.bf16.msra.mxu0 %v4034_v48  ;;  %v4820_v48 = vld [vmem:[#allocation58_spill] sm:$0xff] }
 0x1bf   : > { %1468 = vmatprep.subr.bf16.mxu0 %v4037_v49  ;;  %v4821_v49 = vld [vmem:[#allocation59_spill] sm:$0xff] }
 0x1c2   : > { %1469 = vmatpush1.bf16.msra.mxu0 %v4046_v52 }
 0x1c3   : > { %1470 = vmatprep.subr.bf16.mxu0 %v4814_v63 }
 0x1c6   : > { %1471 = vmatpush1.bf16.msra.mxu0 %v4815_v33 }
 0x1c7   : > { %1472 = vmatprep.subr.bf16.mxu0 %v4816_v36 }
 0x1ca   : > { %1473 = vmatpush1.bf16.msra.mxu0 %v4817_v37 }
 0x1cb   : > { %1474 = vmatprep.subr.bf16.mxu0 %v4818_v40 }
 0x1ce   : > { %1475 = vmatpush1.bf16.msra.mxu0 %v4088_v25 }
 0x1cf   : > { %1476 = vmatprep.subr.bf16.mxu0 %v4819_v44 }
 0x1d2   : > { %1477 = vmatpush1.bf16.msra.mxu0 %v4820_v48  ;;  %v716_v48 = vld [vmem:[%s3869_s4] sm:$0xff] }
 0x1d3   : > { %1478 = vmatprep.subr.bf16.mxu0 %v4821_v49  ;;  %v717_v45 = vunpack.c.l.bf16 %v716_v48  ;;  %v718_v49 = vunpack.c.h.bf16 %v716_v48 }
 0x1d6   : > { %1479 = vmatpush1.bf16.msra.mxu0 %v4114_v27 }
 0x1d7   : > { %1480 = vmatprep.subr.bf16.mxu0 %v4117_v1 }
 0x1da   : > { %1481 = vmatpush1.bf16.msra.mxu0 %v4126_v56  ;;  %v721_v56 = vunpack.c.h.bf16 %v719_v32 }
 0x1db   : > { %1604 = vmatprep.subr.bf16.mxu0 %v3897_v2 }
 0x230   : > { %v1248_v37 = vpop.f32.mrb[0].mxu0 }
 0x231   : > { %v1250_v40 = vpop.f32.mrb[1].mxu0  ;;  %v1337_v41 = vadd.f32 %v1248_v37, %v717_v45 }
 0x232   : > { %v1252_v36 = vpop.f32.mrb[2].mxu0  ;;  %v1338_v27 = vadd.f32 %v1250_v40, %v718_v49 }
 0x233   : > { %v1253_v25 = vpop.f32.mrb[3].mxu0  ;;  %v2572_v1 = vmul.f32 -1.442695, %v1337_v41 }
 0x234   : > { %v2573_v29 = vmul.f32 -1.442695, %v1338_v27 }
 0x235   : > { %2962 = vpow2.f32 %v2572_v1 }
 0x236   : > { %2964 = vpow2.f32 %v2573_v29 }
 0x23a   : > { %v1289_v33 = vpop.f32.mrb[0].mxu1 }
 0x23b   : > { %v1291_v63 = vpop.f32.mrb[1].mxu1  ;;  %v1351_v2 = vadd.f32 %v1289_v33, %v720_v28  ;;  %v695_v28 = vld [vmem:[%s4822_s15] sm:$0x3] }
 0x23c   : > { %v1293_v44 = vpop.f32.mrb[2].mxu1  ;;  %v1352_v23 = vadd.f32 %v1291_v63, %v721_v56  ;;  %v722_v56 = vld [vmem:[%s3882_s24] sm:$0xff] }
 0x23d   : > { %v1294_v52 = vpop.f32.mrb[3].mxu1  ;;  %v2574_v36 = vmul.f32 -1.442695, %v1351_v2  ;;  %v697_v44 = vlaneseq  ;;  %v723_v27 = vunpack.c.l.bf16 %v722_v56 }
 0x23e   : > { %v2575_v25 = vmul.f32 -1.442695, %v1352_v23 }
 0x23f   : > { %2966 = vpow2.f32 %v2574_v36  ;;  %v2963_v22 = vpop.eup %2962  ;;  %v698_v40 = vshrl.u32 %v697_v44, 7 }
 0x240   : > { %2968 = vpow2.f32 %v2575_v25  ;;  %v2965_v52 = vpop.eup %2964  ;;  %v1345_v48 = vadd.f32 1.0, %v2963_v22  ;;  %v724_v25 = vunpack.c.h.bf16 %v722_v56 }
 0x241   : > { %v1346_v37 = vadd.f32 1.0, %v2965_v52  ;;  %v699_v41 = vsub.s32 0, %v698_v40  ;;  %v703_v29 = vsub.s32 1, %v698_v40 }
 0x242   : > { %2970 = vrcp.f32 %v1345_v48 }
 0x243   : > { %2972 = vrcp.f32 %v1346_v37  ;;  %v4274_v33 = vrot.slane %v695_v28, %v699_v41  ;;  %v4277_v1 = vrot.slane %v695_v28, %v703_v29 }
 0x245   : > { %4823 = vst [vmem:[#allocation84_spill] sm:$0xff] %v4274_v33  ;;  %4824 = vst [vmem:[#allocation85_spill] sm:$0xff] %v4277_v1 }
 0x249   : > { %v2967_v45 = vpop.eup %2966 }
 0x24a   : > { %v2969_v32 = vpop.eup %2968  ;;  %v1359_v23 = vadd.f32 1.0, %v2967_v45 }
 0x24b   : > { %v1360_v49 = vadd.f32 1.0, %v2969_v32 }
 0x24c   : > { %2974 = vrcp.f32 %v1359_v23  ;;  %v2971_v36 = vpop.eup %2970  ;;  %v725_v23 = vstv %s4282_s28 }
 0x24d   : > { %2976 = vrcp.f32 %v1360_v49  ;;  %v2973_v48 = vpop.eup %2972  ;;  %v4287_v49 = vld [vmem:[#allocation12] sm:$0xff] }
 0x24e   : > { %4827 = vst [vmem:[#allocation87_spill] sm:$0xff] %v4287_v49  ;;  %vm728_vm1 = vcmp.lt.s32.totalorder %v725_v23, %v4287_v49 }
 0x256   : > { %v2975_v29 = vpop.eup %2974 }
 0x257   : > { %v2977_v32 = vpop.eup %2976  ;;  %v1373_v56 = vsub.f32 1.0, %v2975_v29 }
 0x270   : > { %v1330_v22 = vpop.f32.mrb[4].mxu0 }
 0x271   : > { %v1365_v63 = vadd.f32 %v1330_v22, %v4274_v33  ;;  %v1332_v2 = vpop.f32.mrb[5].mxu0  ;;  %v4285_v22 = vld [vmem:[#allocation10] sm:$0xff] }
 0x272   : > { %v1366_v44 = vadd.f32 %v1332_v2, %v4277_v1  ;;  %v1334_v52 = vpop.f32.mrb[6].mxu0  ;;  %4826 = vst [vmem:[#allocation86_spill] sm:$0xff] %v4285_v22  ;;  %v4289_v2 = vld [vmem:[#allocation10 + $0x8] sm:$0xff]  ;;  %vm726_vm0 = vcmp.ge.s32.totalorder %v725_v23, %v4285_v22 }
 0x273   : > { %v1367_v37 = vmul.f32 %v2971_v36, %v1365_v63  ;;  %v1335_v40 = vpop.f32.mrb[7].mxu0  ;;  %4828 = vst [vmem:[#allocation88_spill] sm:$0xff] %v4289_v2  ;;  %v4291_v63 = vld [vmem:[#allocation12 + $0x8] sm:$0xff]  ;;  %v1374_v36 = vsub.f32 1.0, %v2977_v32  ;;  %vm727_vm2 = vcmp.ge.s32.totalorder %v725_v23, %v4289_v2  ;;  %vm730_vm4 = vmand %vm726_vm0, %vm728_vm1 }
 0x274   : > { %v1368_v41 = vmul.f32 %v2973_v48, %v1366_v44  ;;  %vm729_vm3 = vcmp.lt.s32.totalorder %v725_v23, %v4291_v63  ;;  %v4829_v44 = vld [vmem:[#allocation49_spill] sm:$0xff]  ;;  %v4830_v40 = vld [vmem:[#allocation32_spill] sm:$0xff] }
 0x275   : > { %v1369_v45 = vadd.f32 %v1367_v37, %v723_v27  ;;  %v1377_v52 = vmul.f32 %v2975_v29, %v4829_v44  ;;  %vm731_vm5 = vmand %vm727_vm2, %vm729_vm3 }
 0x276   : > { %v1370_v28 = vadd.f32 %v1368_v41, %v724_v25  ;;  %v1378_v41 = vmul.f32 %v2977_v32, %v4830_v40 }
 0x277   : > { %2978 = vtanh.f32 %v1369_v45  ;;  %v714_v45 = vld [vmem:[#allocation3] sm:$0xff] }
 0x278   : > { %2980 = vtanh.f32 %v1370_v28  ;;  %v715_v28 = vld [vmem:[#allocation3 + $0x8] sm:$0xff] }
 0x281   : > { %v2979_v27 = vpop.eup %2978 }
 0x282   : > { %v2981_v25 = vpop.eup %2980  ;;  %v1375_v48 = vmul.f32 %v2979_v27, %v1373_v56  ;;  %v4834_v27 = vld [vmem:[#allocation57_spill] sm:$0xff] }
 0x283   : > { %v1376_v37 = vmul.f32 %v2981_v25, %v1374_v36  ;;  %v4835_v25 = vld [vmem:[#allocation60_spill] sm:$0xff] }
 0x284   : > { %v1379_v1 = vadd.f32 %v1377_v52, %v1375_v48  ;;  %v4837_v52 = vld [vmem:[#allocation64_spill] sm:$0xff]  ;;  %v4874_v48 = vld [vmem:[#allocation50_spill] sm:$0xff] }
 0x285   : > { %v1380_v22 = vadd.f32 %v1378_v41, %v1376_v37  ;;  %v4875_v37 = vld [vmem:[#allocation51_spill] sm:$0xff] }
 0x286   : > { %v4300_v49 = vsel %vm730_vm4, %v1379_v1, %v4829_v44  ;;  %v1383_v33 = vmax.f32 %v714_v45, %v1379_v1  ;;  %v4831_v1 = vld [vmem:[#allocation52_spill] sm:$0xff]  ;;  %v4836_v44 = vld [vmem:[#allocation61_spill] sm:$0xff]  ;;  %v4877_v41 = vld [vmem:[#allocation55_spill] sm:$0xff] }
 0x287   : > { %v4303_v2 = vsel %vm731_vm5, %v1380_v22, %v4830_v40  ;;  %v1384_v23 = vmax.f32 %v715_v28, %v1380_v22  ;;  %v4313_v36 = vpack.c.bf16 %v4300_v49, %v4300_v49  ;;  %v4832_v22 = vld [vmem:[#allocation53_spill] sm:$0xff]  ;;  %v4876_v40 = vld [vmem:[#allocation54_spill] sm:$0xff] }
 0x288   : > { %v1408_v29 = vpack.c.bf16 %v4303_v2, %v4303_v2  ;;  %v4307_v56 = vsel %vm730_vm4, %v1383_v33, %v714_v45  ;;  %v4833_v33 = vld [vmem:[#allocation56_spill] sm:$0xff]  ;;  %v4878_v45 = vld [vmem:[#allocation58_spill] sm:$0xff] }
 0x289   : > { %v4309_v32 = vsel %vm731_vm5, %v1384_v23, %v715_v28  ;;  %v4879_v28 = vld [vmem:[#allocation59_spill] sm:$0xff]  ;;  %v4880_v23 = vld [vmem:[#allocation62_spill] sm:$0xff] }
 0x28a   : > { %1441 = vmatprep.mubr.bf16.mxu1 %v1408_v29  ;;  %1482 = vmatprep.mubr.bf16.mxu0 %v1408_v29 }
 0x28b   : > { %1442 = vmatmul.mubr.bf16.vlgmr.msra.gmra.mrb[4].mxu1 %v4313_v36  ;;  %1483 = vmatmul.mubr.bf16.vlgmr.msra.gmra.mrb[8].mxu0 %v4313_v36 }
 0x28c   : > { %1492 = vmatpush1.bf16.msra.mxu1 %v4831_v1  ;;  %1523 = vmatprep.mubr.bf16.mxu1 %v1408_v29  ;;  %v4881_v29 = vld [vmem:[#allocation63_spill] sm:$0xff] }
 0x28d   : > { %1493 = vmatprep.subr.bf16.mxu1 %v4832_v22  ;;  %1605 = vmatpush1.bf16.msra.mxu0 %v3899_v3  ;;  %v4838_v3 = vld [vmem:[#allocation65_spill] sm:$0xff] }
 0x28e   : > { %1606 = vmatprep.subr.bf16.mxu0 %v3902_v4  ;;  %v4839_v4 = vld [vmem:[#allocation67_spill] sm:$0xff] }
 0x290   : > { %1494 = vmatpush1.bf16.msra.mxu1 %v4833_v33 }
 0x291   : > { %1495 = vmatprep.subr.bf16.mxu1 %v4834_v27  ;;  %1607 = vmatpush1.bf16.msra.mxu0 %v3905_v5  ;;  %v4840_v5 = vld [vmem:[#allocation68_spill] sm:$0xff] }
 0x292   : > { %1608 = vmatprep.subr.bf16.mxu0 %v3908_v6  ;;  %v4841_v6 = vld [vmem:[#allocation69_spill] sm:$0xff] }
 0x294   : > { %1496 = vmatpush1.bf16.msra.mxu1 %v4835_v25 }
 0x295   : > { %1497 = vmatprep.subr.bf16.mxu1 %v4836_v44  ;;  %1609 = vmatpush1.bf16.msra.mxu0 %v3911_v7  ;;  %v4842_v7 = vld [vmem:[#allocation70_spill] sm:$0xff] }
 0x296   : > { %1610 = vmatprep.subr.bf16.mxu0 %v3914_v8  ;;  %v4843_v8 = vld [vmem:[#allocation71_spill] sm:$0xff] }
 0x298   : > { %1498 = vmatpush1.bf16.msra.mxu1 %v4837_v52 }
 0x299   : > { %1499 = vmatprep.subr.bf16.mxu1 %v4838_v3  ;;  %1611 = vmatpush1.bf16.msra.mxu0 %v3917_v9  ;;  %v4844_v9 = vld [vmem:[#allocation72_spill] sm:$0xff] }
 0x29a   : > { %1612 = vmatprep.subr.bf16.mxu0 %v3920_v10  ;;  %v4845_v10 = vld [vmem:[#allocation73_spill] sm:$0xff] }
 0x29c   : > { %1500 = vmatpush1.bf16.msra.mxu1 %v4839_v4 }
 0x29d   : > { %1501 = vmatprep.subr.bf16.mxu1 %v4840_v5  ;;  %1613 = vmatpush1.bf16.msra.mxu0 %v3923_v11  ;;  %v4846_v11 = vld [vmem:[#allocation74_spill] sm:$0xff] }
 0x29e   : > { %1614 = vmatprep.subr.bf16.mxu0 %v3926_v12  ;;  %v4847_v12 = vld [vmem:[#allocation75_spill] sm:$0xff] }
 0x2a0   : > { %1502 = vmatpush1.bf16.msra.mxu1 %v4841_v6 }
 0x2a1   : > { %1503 = vmatprep.subr.bf16.mxu1 %v4842_v7  ;;  %1615 = vmatpush1.bf16.msra.mxu0 %v3933_v15  ;;  %v4848_v15 = vld [vmem:[#allocation76_spill] sm:$0xff] }
 0x2a2   : > { %1616 = vmatprep.subr.bf16.mxu0 %v3937_v16  ;;  %v4849_v16 = vld [vmem:[#allocation77_spill] sm:$0xff] }
 0x2a4   : > { %1504 = vmatpush1.bf16.msra.mxu1 %v4843_v8 }
 0x2a5   : > { %1505 = vmatprep.subr.bf16.mxu1 %v4844_v9  ;;  %1617 = vmatpush1.bf16.msra.mxu0 %v3946_v19  ;;  %v4850_v19 = vld [vmem:[#allocation78_spill] sm:$0xff] }
 0x2a6   : > { %1618 = vmatprep.subr.bf16.mxu0 %v3948_v20  ;;  %v4851_v20 = vld [vmem:[#allocation79_spill] sm:$0xff] }
 0x2a8   : > { %1506 = vmatpush1.bf16.msra.mxu1 %v4845_v10 }
 0x2a9   : > { %1507 = vmatprep.subr.bf16.mxu1 %v4846_v11  ;;  %1619 = vmatpush1.bf16.msra.mxu0 %v3959_v24  ;;  %v4852_v24 = vld [vmem:[#allocation80_spill] sm:$0xff] }
 0x2aa   : > { %1620 = vmatprep.subr.bf16.mxu0 %v3964_v26  ;;  %v4853_v26 = vld [vmem:[#allocation81_spill] sm:$0xff] }
 0x2ac   : > { %1508 = vmatpush1.bf16.msra.mxu1 %v4847_v12 }
 0x2ad   : > { %1509 = vmatprep.subr.bf16.mxu1 %v4848_v15  ;;  %1621 = vmatpush1.bf16.msra.mxu0 %v3980_v30  ;;  %v4854_v30 = vld [vmem:[#allocation82_spill] sm:$0xff] }
 0x2ae   : > { %1622 = vmatprep.subr.bf16.mxu0 %v3983_v31  ;;  %v4855_v31 = vld [vmem:[#allocation83_spill] sm:$0xff] }
 0x2b0   : > { %1510 = vmatpush1.bf16.msra.mxu1 %v4849_v16 }
 0x2b1   : > { %1511 = vmatprep.subr.bf16.mxu1 %v4850_v19  ;;  %1623 = vmatpush1.bf16.msra.mxu0 %v3991_v34  ;;  %v4856_v34 = vld [vmem:[#allocation30_spill] sm:$0xff] }
 0x2b2   : > { %1624 = vmatprep.subr.bf16.mxu0 %v3994_v35  ;;  %v4857_v35 = vld [vmem:[#allocation31_spill] sm:$0xff] }
 0x2b4   : > { %1512 = vmatpush1.bf16.msra.mxu1 %v4851_v20 }
 0x2b5   : > { %1513 = vmatprep.subr.bf16.mxu1 %v4852_v24  ;;  %1625 = vmatpush1.bf16.msra.mxu0 %v4004_v38  ;;  %v4858_v38 = vld [vmem:[#allocation33_spill] sm:$0xff] }
 0x2b6   : > { %1626 = vmatprep.subr.bf16.mxu0 %v4007_v39  ;;  %v4860_v39 = vld [vmem:[#allocation35_spill] sm:$0xff] }
 0x2b8   : > { %1514 = vmatpush1.bf16.msra.mxu1 %v4853_v26 }
 0x2b9   : > { %1515 = vmatprep.subr.bf16.mxu1 %v4854_v30  ;;  %1627 = vmatpush1.bf16.msra.mxu0 %v4015_v42  ;;  %v4861_v42 = vld [vmem:[#allocation36_spill] sm:$0xff] }
 0x2ba   : > { %1628 = vmatprep.subr.bf16.mxu0 %v4018_v43  ;;  %v4862_v43 = vld [vmem:[#allocation37_spill] sm:$0xff] }
 0x2bc   : > { %1516 = vmatpush1.bf16.msra.mxu1 %v4195_v59 }
 0x2bd   : > { %1517 = vmatprep.subr.bf16.mxu1 %v4855_v31  ;;  %1629 = vmatpush1.bf16.msra.mxu0 %v4028_v46  ;;  %v4867_v46 = vld [vmem:[#allocation42_spill] sm:$0xff] }
 0x2be   : > { %1630 = vmatprep.subr.bf16.mxu0 %v4031_v47  ;;  %v4868_v47 = vld [vmem:[#allocation43_spill] sm:$0xff] }
 0x2c0   : > { %1518 = vmatpush1.bf16.msra.mxu1 %v4203_v62 }
 0x2c1   : > { %1519 = vmatprep.subr.bf16.mxu1 %v4206_v61  ;;  %1631 = vmatpush1.bf16.msra.mxu0 %v4039_v50  ;;  %v4869_v50 = vld [vmem:[#allocation44_spill] sm:$0xff] }
 0x2c2   : > { %1632 = vmatprep.subr.bf16.mxu0 %v4042_v51  ;;  %v4870_v51 = vld [vmem:[#allocation45_spill] sm:$0xff] }
 0x2c4   : > { %1520 = vmatpush1.bf16.msra.mxu1 %v4211_v53 }
 0x2c5   : > { %1521 = vmatprep.subr.bf16.mxu1 %v4214_v0  ;;  %1633 = vmatpush1.bf16.msra.mxu0 %v4052_v54  ;;  %v4871_v54 = vld [vmem:[#allocation46_spill] sm:$0xff] }
 0x2c6   : > { %1634 = vmatprep.subr.bf16.mxu0 %v4055_v55  ;;  %v4872_v55 = vld [vmem:[#allocation47_spill] sm:$0xff] }
 0x2c8   : > { %1522 = vmatpush1.bf16.msra.mxu1 %v4219_v57 }
 0x2c9   : > { %1645 = vmatprep.subr.bf16.mxu1 %v3928_v13  ;;  %1635 = vmatpush1.bf16.msra.mxu0 %v4063_v58  ;;  %v4859_v13 = vld [vmem:[#allocation34_spill] sm:$0xff]  ;;  %v4873_v58 = vld [vmem:[#allocation48_spill] sm:$0xff] }
 0x2ca   : > { %1686 = vmatprep.subr.bf16.mxu0 %v4069_v60 }
 0x2cb   : > { %1524 = vmatmul.mubr.bf16.vlgmr.msra.gmra.mrb[8].mxu1 %v4313_v36  ;;  %v4882_v36 = vld [vmem:[#allocation66_spill] sm:$0xff] }
 0x2cc   : > { %1646 = vmatpush1.bf16.msra.mxu1 %v3930_v14  ;;  %v4863_v14 = vld [vmem:[#allocation38_spill] sm:$0xff] }
 0x2cd   : > { %1647 = vmatprep.subr.bf16.mxu1 %v3940_v17  ;;  %v4864_v17 = vld [vmem:[#allocation39_spill] sm:$0xff] }
 0x2d0   : > { %1648 = vmatpush1.bf16.msra.mxu1 %v3942_v18  ;;  %v4865_v18 = vld [vmem:[#allocation40_spill] sm:$0xff] }
 0x2d1   : > { %1649 = vmatprep.subr.bf16.mxu1 %v3950_v21  ;;  %v4866_v21 = vld [vmem:[#allocation41_spill] sm:$0xff] }
 0x2d4   : > { %1650 = vmatpush1.bf16.msra.mxu1 %v4856_v34  ;;  %v3042_v34 = vld [vmem:[#allocation13 + $0x4] ss:$24 sps:$4 sm:$0xff]  }
 0x2d5   : > { %1651 = vmatprep.subr.bf16.mxu1 %v4857_v35 }
 0x2d8   : > { %1652 = vmatpush1.bf16.msra.mxu1 %v4858_v38 }
 0x2d9   : > { %1653 = vmatprep.subr.bf16.mxu1 %v4859_v13 }
 0x2dc   : > { %1654 = vmatpush1.bf16.msra.mxu1 %v4860_v39 }
 0x2dd   : > { %1655 = vmatprep.subr.bf16.mxu1 %v4861_v42 }
 0x2e0   : > { %1656 = vmatpush1.bf16.msra.mxu1 %v4862_v43 }
 0x2e1   : > { %1657 = vmatprep.subr.bf16.mxu1 %v4863_v14 }
 0x2e4   : > { %1658 = vmatpush1.bf16.msra.mxu1 %v4864_v17 }
 0x2e5   : > { %1659 = vmatprep.subr.bf16.mxu1 %v4865_v18  ;;  %v2576_v18 = vld [vmem:[%s3869_s4 + $0x8] sm:$0xff] }
 0x2e8   : > { %1660 = vmatpush1.bf16.msra.mxu1 %v4866_v21  ;;  %v1389_v21 = vunpack.c.l.bf16 %v2576_v18 }
 0x2e9   : > { %1661 = vmatprep.subr.bf16.mxu1 %v4867_v46  ;;  %v1390_v46 = vunpack.c.h.bf16 %v2576_v18 }
 0x2ec   : > { %1662 = vmatpush1.bf16.msra.mxu1 %v4868_v47 }
 0x2ed   : > { %1663 = vmatprep.subr.bf16.mxu1 %v4869_v50 }
 0x2f0   : > { %1664 = vmatpush1.bf16.msra.mxu1 %v4870_v51 }
 0x2f1   : > { %1665 = vmatprep.subr.bf16.mxu1 %v4871_v54  ;;  %v2577_v54 = vld [vmem:[%s3876_s13 + $0x8] sm:$0xff] }
 0x2f4   : > { %1666 = vmatpush1.bf16.msra.mxu1 %v4872_v55 }
 0x2f5   : > { %1667 = vmatprep.subr.bf16.mxu1 %v4873_v58  ;;  %v1393_v58 = vunpack.c.l.bf16 %v2577_v54 }
 0x2f8   : > { %1668 = vmatpush1.bf16.msra.mxu1 %v4874_v48  ;;  %v1394_v48 = vunpack.c.h.bf16 %v2577_v54 }
 0x2f9   : > { %1669 = vmatprep.subr.bf16.mxu1 %v4875_v37 }
 0x2fc   : > { %1670 = vmatpush1.bf16.msra.mxu1 %v4876_v40 }
 0x2fd   : > { %1671 = vmatprep.subr.bf16.mxu1 %v4877_v41 }
 0x300   : > { %1672 = vmatpush1.bf16.msra.mxu1 %v4878_v45 }
 0x301   : > { %1673 = vmatprep.subr.bf16.mxu1 %v4879_v28 }
 0x304   : > { %1674 = vmatpush1.bf16.msra.mxu1 %v4880_v23 }
 0x305   : > { %1675 = vmatprep.subr.bf16.mxu1 %v4881_v29 }
 0x308   : > { %1676 = vmatpush1.bf16.msra.mxu1 %v4882_v36 }
 0x309   : > { %1799 = vmatprep.subr.bf16.mxu1 %v3042_v34 }
 0x35e   : > { %v1443_v35 = vpop.f32.mrb[4].mxu1  ;;  %v1484_v38 = vpop.f32.mrb[8].mxu0 }
 0x35f   : > { %v1445_v13 = vpop.f32.mrb[5].mxu1  ;;  %v1486_v39 = vpop.f32.mrb[9].mxu0  ;;  %v1532_v47 = vadd.f32 %v1443_v35, %v1389_v21  ;;  %v1546_v37 = vadd.f32 %v1484_v38, %v1393_v58 }
 0x360   : > { %v1447_v42 = vpop.f32.mrb[6].mxu1  ;;  %v1488_v43 = vpop.f32.mrb[10].mxu0  ;;  %v1533_v50 = vadd.f32 %v1445_v13, %v1390_v46  ;;  %v1547_v40 = vadd.f32 %v1486_v39, %v1394_v48 }
 0x361   : > { %v1448_v14 = vpop.f32.mrb[7].mxu1  ;;  %v1489_v17 = vpop.f32.mrb[11].mxu0  ;;  %v2579_v51 = vmul.f32 -1.442695, %v1532_v47  ;;  %v2581_v41 = vmul.f32 -1.442695, %v1546_v37 }
 0x362   : > { %v2580_v55 = vmul.f32 -1.442695, %v1533_v50  ;;  %v2582_v45 = vmul.f32 -1.442695, %v1547_v40  ;;  %v2578_v17 = vld [vmem:[%s3882_s24 + $0x8] sm:$0xff]  ;;  %v4883_v50 = vld [vmem:[#allocation84_spill] sm:$0xff] }
 0x363   : > { %2982 = vpow2.f32 %v2579_v51  ;;  %v1397_v47 = vunpack.c.l.bf16 %v2578_v17  ;;  %v1398_v54 = vunpack.c.h.bf16 %v2578_v17  ;;  %v4886_v17 = vld [vmem:[#allocation87_spill] sm:$0xff] }
 0x364   : > { %2984 = vpow2.f32 %v2580_v55  ;;  %v4884_v55 = vld [vmem:[#allocation85_spill] sm:$0xff] }
 0x365   : > { %2986 = vpow2.f32 %v2581_v41 }
 0x366   : > { %2988 = vpow2.f32 %v2582_v45 }
 0x36d   : > { %v2983_v34 = vpop.eup %2982 }
 0x36e   : > { %v2985_v42 = vpop.eup %2984  ;;  %v1540_v43 = vadd.f32 1.0, %v2983_v34 }
 0x36f   : > { %v1541_v14 = vadd.f32 1.0, %v2985_v42  ;;  %v2987_v35 = vpop.eup %2986 }
 0x370   : > { %2990 = vrcp.f32 %v1540_v43  ;;  %v2989_v13 = vpop.eup %2988  ;;  %v1554_v18 = vadd.f32 1.0, %v2987_v35 }
 0x371   : > { %2992 = vrcp.f32 %v1541_v14  ;;  %v1555_v21 = vadd.f32 1.0, %v2989_v13  ;;  %v1400_v14 = vstv %s1399_s5 }
 0x372   : > { %2994 = vrcp.f32 %v1554_v18  ;;  %vm1403_vm7 = vcmp.lt.s32.totalorder %v1400_v14, %v4886_v17  ;;  %vm1404_vm9 = vcmp.lt.s32.totalorder %v1400_v14, %v4291_v63 }
 0x373   : > { %2996 = vrcp.f32 %v1555_v21 }
 0x37a   : > { %v2991_v51 = vpop.eup %2990 }
 0x37b   : > { %v2993_v37 = vpop.eup %2992 }
 0x37c   : > { %v2995_v43 = vpop.eup %2994 }
 0x37d   : > { %v2997_v35 = vpop.eup %2996  ;;  %v1568_v13 = vsub.f32 1.0, %v2995_v43 }
 0x37e   : > { %v1569_v18 = vsub.f32 1.0, %v2997_v35 }
 0x39e   : > { %v1525_v46 = vpop.f32.mrb[8].mxu1 }
 0x39f   : > { %v1560_v38 = vadd.f32 %v1525_v46, %v4883_v50  ;;  %v1527_v39 = vpop.f32.mrb[9].mxu1  ;;  %v4885_v46 = vld [vmem:[#allocation86_spill] sm:$0xff] }
 0x3a0   : > { %v1561_v58 = vadd.f32 %v1527_v39, %v4884_v55  ;;  %v1529_v48 = vpop.f32.mrb[10].mxu1  ;;  %vm1401_vm6 = vcmp.ge.s32.totalorder %v1400_v14, %v4885_v46 }
 0x3a1   : > { %v1562_v40 = vmul.f32 %v2991_v51, %v1560_v38  ;;  %v1530_v41 = vpop.f32.mrb[11].mxu1  ;;  %v4887_v48 = vld [vmem:[#allocation88_spill] sm:$0xff]  ;;  %vm1405_vm10 = vmand %vm1401_vm6, %vm1403_vm7 }
 0x3a2   : > { %v1563_v45 = vmul.f32 %v2993_v37, %v1561_v58  ;;  %vm1402_vm8 = vcmp.ge.s32.totalorder %v1400_v14, %v4887_v48 }
 0x3a3   : > { %v1564_v34 = vadd.f32 %v1562_v40, %v1397_v47  ;;  %v1572_v47 = vmul.f32 %v2995_v43, %v4300_v49  ;;  %vm1406_vm11 = vmand %vm1402_vm8, %vm1404_vm9  ;;  %vm3502_vm8 = vmmov (!%p2597_p5), 0  }
 0x3a4   : > { %v1565_v42 = vadd.f32 %v1563_v45, %v1398_v54  ;;  %v1573_v54 = vmul.f32 %v2997_v35, %v4303_v2  ;;  %v3046_v35 = vld [vmem:[#allocation13 + $0x64] ss:$24 sps:$4 sm:$0xff]  }
 0x3a5   : > { %2998 = vtanh.f32 %v1564_v34 }
 0x3a6   : > { %3000 = vtanh.f32 %v1565_v42 }
 0x3af   : > { %v2999_v39 = vpop.eup %2998 }
 0x3b0   : > { %v3001_v21 = vpop.eup %3000  ;;  %v1570_v38 = vmul.f32 %v2999_v39, %v1568_v13  ;;  %v3048_v13 = vld [vmem:[#allocation13 + $0x94] ss:$24 sps:$4 sm:$0xff]   ;;  %v3074_v39 = vld [vmem:[#allocation13 + $0x2d0] ss:$24 sps:$4 sm:$0xff]  }
 0x3b1   : > { %v1571_v51 = vmul.f32 %v3001_v21, %v1569_v18  ;;  %v3079_v18 = vld [vmem:[#allocation13 + $0x68] ss:$24 sps:$4 sm:$0xff]   ;;  %v3080_v21 = vld [vmem:[#allocation13 + $0x9c] ss:$24 sps:$4 sm:$0xff]  }
 0x3b2   : > { %v1574_v58 = vadd.f32 %v1572_v47, %v1570_v38  ;;  %v3082_v47 = vld [vmem:[#allocation13 + $0xcc] ss:$24 sps:$4 sm:$0xff]   ;;  %v3083_v38 = vld [vmem:[#allocation13 + $0xc8] ss:$24 sps:$4 sm:$0xff]  }
 0x3b3   : > { %v1575_v37 = vadd.f32 %v1573_v54, %v1571_v51  ;;  %v3085_v51 = vld [vmem:[#allocation13 + $0xf8] ss:$24 sps:$4 sm:$0xff]   ;;  %v3086_v54 = vld [vmem:[#allocation13 + $0x12c] ss:$24 sps:$4 sm:$0xff]  }
 0x3b4   : > { %v4426_v40 = vsel %vm1405_vm10, %v1574_v58, %v4300_v49  ;;  %v1578_v41 = vmax.f32 %v4307_v56, %v1574_v58  ;;  %v3087_v58 = vld [vmem:[#allocation13 + $0x128] ss:$24 sps:$4 sm:$0xff]  }
 0x3b5   : > { %v4430_v45 = vsel %vm1406_vm11, %v1575_v37, %v4303_v2  ;;  %v1579_v34 = vmax.f32 %v4309_v32, %v1575_v37  ;;  %v4443_v49 = vpack.c.bf16 %v4426_v40, %v4426_v40  ;;  %v3043_v2 = vld [vmem:[#allocation13] ss:$24 sps:$4 sm:$0xff]   ;;  %v3088_v37 = vld [vmem:[#allocation13 + $0x15c] ss:$24 sps:$4 sm:$0xff]  }
 0x3b6   : > { %v1603_v42 = vpack.c.bf16 %v4430_v45, %v4430_v45  ;;  %v4436_v43 = vsel %vm1405_vm10, %v1578_v41, %v4307_v56  ;;  %v3044_v56 = vld [vmem:[#allocation13 + $0x34] ss:$24 sps:$4 sm:$0xff]   ;;  %v3089_v41 = vld [vmem:[#allocation13 + $0x158] ss:$24 sps:$4 sm:$0xff]  }
 0x3b7   : > { %v4439_v14 = vsel %vm1406_vm11, %v1579_v34, %v4309_v32  ;;  %v3045_v32 = vld [vmem:[#allocation13 + $0x30] ss:$24 sps:$4 sm:$0xff]   ;;  %v3090_v34 = vld [vmem:[#allocation13 + $0x18c] ss:$24 sps:$4 sm:$0xff]  }
 0x3b8   : > { %1636 = vmatprep.mubr.bf16.mxu0 %v1603_v42  ;;  %1677 = vmatprep.mubr.bf16.mxu1 %v1603_v42 }
 0x3b9   : > { %1637 = vmatmul.mubr.bf16.vlgmr.msra.gmra.mrb[12].mxu0 %v4443_v49  ;;  %1678 = vmatmul.mubr.bf16.vlgmr.msra.gmra.mrb[12].mxu1 %v4443_v49 }
 0x3ba   : > { %1687 = vmatpush1.bf16.msra.mxu0 %v4831_v1  ;;  %1718 = vmatprep.mubr.bf16.mxu0 %v1603_v42  ;;  %v3047_v1 = vld [vmem:[#allocation13 + $0x60] ss:$24 sps:$4 sm:$0xff]  }
 0x3bb   : > { %1688 = vmatprep.subr.bf16.mxu0 %v4832_v22  ;;  %1800 = vmatpush1.bf16.msra.mxu1 %v3043_v2  ;;  %v3049_v22 = vld [vmem:[#allocation13 + $0x90] ss:$24 sps:$4 sm:$0xff]  }
 0x3bc   : > { %1801 = vmatprep.subr.bf16.mxu1 %v3044_v56  ;;  %v3091_v42 = vld [vmem:[#allocation13 + $0x188] ss:$24 sps:$4 sm:$0xff]   ;;  %v3093_v2 = vld [vmem:[#allocation13 + $0x1b8] ss:$24 sps:$4 sm:$0xff]   ;;  %v3094_v56 = vld [vmem:[#allocation13 + $0x1ec] ss:$24 sps:$4 sm:$0xff]  }
 0x3be   : > { %1689 = vmatpush1.bf16.msra.mxu0 %v4833_v33  ;;  %v3050_v33 = vld [vmem:[#allocation13 + $0xc4] ss:$24 sps:$4 sm:$0xff]  }
 0x3bf   : > { %1690 = vmatprep.subr.bf16.mxu0 %v4834_v27  ;;  %1802 = vmatpush1.bf16.msra.mxu1 %v3045_v32  ;;  %v3051_v27 = vld [vmem:[#allocation13 + $0xc0] ss:$24 sps:$4 sm:$0xff]  }
 0x3c0   : > { %1803 = vmatprep.subr.bf16.mxu1 %v3046_v35  ;;  %v3095_v32 = vld [vmem:[#allocation13 + $0x1e8] ss:$24 sps:$4 sm:$0xff]   ;;  %v3096_v35 = vld [vmem:[#allocation13 + $0x21c] ss:$24 sps:$4 sm:$0xff]  }
 0x3c2   : > { %1691 = vmatpush1.bf16.msra.mxu0 %v4835_v25  ;;  %v3052_v25 = vld [vmem:[#allocation13 + $0xf4] ss:$24 sps:$4 sm:$0xff]  }
 0x3c3   : > { %1692 = vmatprep.subr.bf16.mxu0 %v4836_v44  ;;  %1804 = vmatpush1.bf16.msra.mxu1 %v3047_v1  ;;  %v3053_v44 = vld [vmem:[#allocation13 + $0xf0] ss:$24 sps:$4 sm:$0xff]  }
 0x3c4   : > { %1805 = vmatprep.subr.bf16.mxu1 %v3048_v13  ;;  %v3097_v1 = vld [vmem:[#allocation13 + $0x218] ss:$24 sps:$4 sm:$0xff]   ;;  %v3098_v13 = vld [vmem:[#allocation13 + $0x24c] ss:$24 sps:$4 sm:$0xff]  }
 0x3c6   : > { %1693 = vmatpush1.bf16.msra.mxu0 %v4837_v52  ;;  %v3054_v52 = vld [vmem:[#allocation13 + $0x124] ss:$24 sps:$4 sm:$0xff]  }
 0x3c7   : > { %1694 = vmatprep.subr.bf16.mxu0 %v4838_v3  ;;  %1806 = vmatpush1.bf16.msra.mxu1 %v3049_v22  ;;  %v3055_v3 = vld [vmem:[#allocation13 + $0x120] ss:$24 sps:$4 sm:$0xff]  }
 0x3c8   : > { %1807 = vmatprep.subr.bf16.mxu1 %v3050_v33  ;;  %v3099_v22 = vld [vmem:[#allocation13 + $0x248] ss:$24 sps:$4 sm:$0xff]   ;;  %v3100_v33 = vld [vmem:[#allocation13 + $0x27c] ss:$24 sps:$4 sm:$0xff]  }
 0x3ca   : > { %1695 = vmatpush1.bf16.msra.mxu0 %v4839_v4  ;;  %v3056_v4 = vld [vmem:[#allocation13 + $0x154] ss:$24 sps:$4 sm:$0xff]  }
 0x3cb   : > { %1696 = vmatprep.subr.bf16.mxu0 %v4840_v5  ;;  %1808 = vmatpush1.bf16.msra.mxu1 %v3051_v27  ;;  %v3057_v5 = vld [vmem:[#allocation13 + $0x150] ss:$24 sps:$4 sm:$0xff]  }
 0x3cc   : > { %1809 = vmatprep.subr.bf16.mxu1 %v3052_v25  ;;  %v3101_v27 = vld [vmem:[#allocation13 + $0x278] ss:$24 sps:$4 sm:$0xff]  }
 0x3ce   : > { %1697 = vmatpush1.bf16.msra.mxu0 %v4841_v6  ;;  %v3058_v6 = vld [vmem:[#allocation13 + $0x184] ss:$24 sps:$4 sm:$0xff]  }
 0x3cf   : > { %1698 = vmatprep.subr.bf16.mxu0 %v4842_v7  ;;  %1810 = vmatpush1.bf16.msra.mxu1 %v3053_v44  ;;  %v3059_v7 = vld [vmem:[#allocation13 + $0x180] ss:$24 sps:$4 sm:$0xff]  }
 0x3d0   : > { %1811 = vmatprep.subr.bf16.mxu1 %v3054_v52 }
 0x3d2   : > { %1699 = vmatpush1.bf16.msra.mxu0 %v4843_v8  ;;  %v3060_v8 = vld [vmem:[#allocation13 + $0x1b4] ss:$24 sps:$4 sm:$0xff]  }
 0x3d3   : > { %1700 = vmatprep.subr.bf16.mxu0 %v4844_v9  ;;  %1812 = vmatpush1.bf16.msra.mxu1 %v3055_v3  ;;  %v3061_v9 = vld [vmem:[#allocation13 + $0x1b0] ss:$24 sps:$4 sm:$0xff]  }
 0x3d4   : > { %1813 = vmatprep.subr.bf16.mxu1 %v3056_v4 }
 0x3d6   : > { %1701 = vmatpush1.bf16.msra.mxu0 %v4845_v10  ;;  %v3062_v10 = vld [vmem:[#allocation13 + $0x1e4] ss:$24 sps:$4 sm:$0xff]  }
 0x3d7   : > { %1702 = vmatprep.subr.bf16.mxu0 %v4846_v11  ;;  %1814 = vmatpush1.bf16.msra.mxu1 %v3057_v5  ;;  %v3063_v11 = vld [vmem:[#allocation13 + $0x1e0] ss:$24 sps:$4 sm:$0xff]  }
 0x3d8   : > { %1815 = vmatprep.subr.bf16.mxu1 %v3058_v6 }
 0x3da   : > { %1703 = vmatpush1.bf16.msra.mxu0 %v4847_v12  ;;  %v3064_v12 = vld [vmem:[#allocation13 + $0x214] ss:$24 sps:$4 sm:$0xff]  }
 0x3db   : > { %1704 = vmatprep.subr.bf16.mxu0 %v4848_v15  ;;  %1816 = vmatpush1.bf16.msra.mxu1 %v3059_v7  ;;  %v3065_v15 = vld [vmem:[#allocation13 + $0x210] ss:$24 sps:$4 sm:$0xff]  }
 0x3dc   : > { %1817 = vmatprep.subr.bf16.mxu1 %v3060_v8  ;;  %v2583_v8 = vld [vmem:[%s3869_s4 + $0x10] sm:$0xff] }
 0x3de   : > { %1705 = vmatpush1.bf16.msra.mxu0 %v4849_v16  ;;  %v3066_v16 = vld [vmem:[#allocation13 + $0x244] ss:$24 sps:$4 sm:$0xff]  }
 0x3df   : > { %1706 = vmatprep.subr.bf16.mxu0 %v4850_v19  ;;  %1818 = vmatpush1.bf16.msra.mxu1 %v3061_v9  ;;  %v3067_v19 = vld [vmem:[#allocation13 + $0x240] ss:$24 sps:$4 sm:$0xff]   ;;  %v1584_v9 = vunpack.c.l.bf16 %v2583_v8 }
 0x3e0   : > { %1819 = vmatprep.subr.bf16.mxu1 %v3062_v10  ;;  %v1585_v10 = vunpack.c.h.bf16 %v2583_v8 }
 0x3e2   : > { %1707 = vmatpush1.bf16.msra.mxu0 %v4851_v20  ;;  %v3068_v20 = vld [vmem:[#allocation13 + $0x274] ss:$24 sps:$4 sm:$0xff]  }
 0x3e3   : > { %1708 = vmatprep.subr.bf16.mxu0 %v4852_v24  ;;  %1820 = vmatpush1.bf16.msra.mxu1 %v3063_v11  ;;  %v3069_v24 = vld [vmem:[#allocation13 + $0x270] ss:$24 sps:$4 sm:$0xff]  }
 0x3e4   : > { %1821 = vmatprep.subr.bf16.mxu1 %v3064_v12 }
 0x3e6   : > { %1709 = vmatpush1.bf16.msra.mxu0 %v4853_v26  ;;  %v3070_v26 = vld [vmem:[#allocation13 + $0x2a4] ss:$24 sps:$4 sm:$0xff]  }
 0x3e7   : > { %1710 = vmatprep.subr.bf16.mxu0 %v4854_v30  ;;  %1822 = vmatpush1.bf16.msra.mxu1 %v3065_v15  ;;  %v3071_v30 = vld [vmem:[#allocation13 + $0x2a0] ss:$24 sps:$4 sm:$0xff]  }
 0x3e8   : > { %1823 = vmatprep.subr.bf16.mxu1 %v3066_v16 }
 0x3ea   : > { %1711 = vmatpush1.bf16.msra.mxu0 %v4195_v59  ;;  %v3072_v59 = vld [vmem:[#allocation13 + $0x2d4] ss:$24 sps:$4 sm:$0xff]  }
 0x3eb   : > { %1712 = vmatprep.subr.bf16.mxu0 %v4855_v31  ;;  %1824 = vmatpush1.bf16.msra.mxu1 %v3067_v19  ;;  %v3073_v31 = vld [vmem:[#allocation13 + $0xc] ss:$24 sps:$4 sm:$0xff]  }
 0x3ec   : > { %1825 = vmatprep.subr.bf16.mxu1 %v3068_v20 }
 0x3ee   : > { %1713 = vmatpush1.bf16.msra.mxu0 %v4203_v62  ;;  %v3076_v62 = vld [vmem:[#allocation13 + $0x3c] ss:$24 sps:$4 sm:$0xff]  }
 0x3ef   : > { %1714 = vmatprep.subr.bf16.mxu0 %v4206_v61  ;;  %1826 = vmatpush1.bf16.msra.mxu1 %v3069_v24  ;;  %v3075_v61 = vld [vmem:[#allocation13 + $0x8] ss:$24 sps:$4 sm:$0xff]  }
 0x3f0   : > { %1827 = vmatprep.subr.bf16.mxu1 %v3070_v26 }
 0x3f2   : > { %1715 = vmatpush1.bf16.msra.mxu0 %v4211_v53  ;;  %v3077_v53 = vld [vmem:[#allocation13 + $0x38] ss:$24 sps:$4 sm:$0xff]  }
 0x3f3   : > { %1716 = vmatprep.subr.bf16.mxu0 %v4214_v0  ;;  %1828 = vmatpush1.bf16.msra.mxu1 %v3071_v30  ;;  %v3078_v0 = vld [vmem:[#allocation13 + $0x6c] ss:$24 sps:$4 sm:$0xff]  }
 0x3f4   : > { %1829 = vmatprep.subr.bf16.mxu1 %v3072_v59 }
 0x3f6   : > { %1717 = vmatpush1.bf16.msra.mxu0 %v4219_v57  ;;  %v3081_v57 = vld [vmem:[#allocation13 + $0x98] ss:$24 sps:$4 sm:$0xff]  }
 0x3f7   : > { %1840 = vmatprep.subr.bf16.mxu0 %v3073_v31  ;;  %1830 = vmatpush1.bf16.msra.mxu1 %v3074_v39 }
 0x3f8   : > { %1881 = vmatprep.subr.bf16.mxu1 %v4069_v60  ;;  %v3084_v60 = vld [vmem:[#allocation13 + $0xfc] ss:$24 sps:$4 sm:$0xff]  }
 0x3f9   : > { %1719 = vmatmul.mubr.bf16.vlgmr.msra.gmra.mrb[16].mxu0 %v4443_v49  ;;  %v3092_v49 = vld [vmem:[#allocation13 + $0x1bc] ss:$24 sps:$4 sm:$0xff]  }
 0x3fa   : > { %1841 = vmatpush1.bf16.msra.mxu0 %v3075_v61 }
 0x3fb   : > { %1842 = vmatprep.subr.bf16.mxu0 %v3076_v62  ;;  %v2585_v62 = vld [vmem:[%s3882_s24 + $0x10] sm:$0xff] }
 0x3fe   : > { %1843 = vmatpush1.bf16.msra.mxu0 %v3077_v53 }
 0x3ff   : > { %1844 = vmatprep.subr.bf16.mxu0 %v3078_v0 }
 0x402   : > { %1845 = vmatpush1.bf16.msra.mxu0 %v3079_v18 }
 0x403   : > { %1846 = vmatprep.subr.bf16.mxu0 %v3080_v21  ;;  %v1592_v21 = vunpack.c.l.bf16 %v2585_v62 }
 0x406   : > { %1847 = vmatpush1.bf16.msra.mxu0 %v3081_v57 }
 0x407   : > { %1848 = vmatprep.subr.bf16.mxu0 %v3082_v47 }
 0x40a   : > { %1849 = vmatpush1.bf16.msra.mxu0 %v3083_v38 }
 0x40b   : > { %1850 = vmatprep.subr.bf16.mxu0 %v3084_v60  ;;  %v1593_v60 = vunpack.c.h.bf16 %v2585_v62  ;;  %v3122_v62 = vld [vmem:[#allocation13 + $0x1f0] ss:$24 sps:$4 sm:$0xff]  }
 0x40e   : > { %1851 = vmatpush1.bf16.msra.mxu0 %v3085_v51 }
 0x40f   : > { %1852 = vmatprep.subr.bf16.mxu0 %v3086_v54 }
 0x412   : > { %1853 = vmatpush1.bf16.msra.mxu0 %v3087_v58 }
 0x413   : > { %1854 = vmatprep.subr.bf16.mxu0 %v3088_v37 }
 0x416   : > { %1855 = vmatpush1.bf16.msra.mxu0 %v3089_v41 }
 0x417   : > { %1856 = vmatprep.subr.bf16.mxu0 %v3090_v34 }
 0x41a   : > { %1857 = vmatpush1.bf16.msra.mxu0 %v3091_v42 }
 0x41b   : > { %1858 = vmatprep.subr.bf16.mxu0 %v3092_v49 }
 0x41e   : > { %1859 = vmatpush1.bf16.msra.mxu0 %v3093_v2 }
 0x41f   : > { %1860 = vmatprep.subr.bf16.mxu0 %v3094_v56  ;;  %v1595_v56 = vstv %s1594_s8 }
 0x420   : > { %vm1596_vm12 = vcmp.ge.s32.totalorder %v1595_v56, %v4885_v46  ;;  %vm1598_vm13 = vcmp.lt.s32.totalorder %v1595_v56, %v4886_v17  ;;  %vm1597_vm14 = vcmp.ge.s32.totalorder %v1595_v56, %v4887_v48  ;;  %vm1599_vm15 = vcmp.lt.s32.totalorder %v1595_v56, %v4291_v63 }
 0x421   : > { %vm1600_vm0 = vmand %vm1596_vm12, %vm1598_vm13 }
 0x422   : > { %1861 = vmatpush1.bf16.msra.mxu0 %v3095_v32  ;;  %vm1601_vm1 = vmand %vm1597_vm14, %vm1599_vm15 }
 0x423   : > { %1862 = vmatprep.subr.bf16.mxu0 %v3096_v35 }
 0x426   : > { %1863 = vmatpush1.bf16.msra.mxu0 %v3097_v1 }
 0x427   : > { %1864 = vmatprep.subr.bf16.mxu0 %v3098_v13 }
 0x42a   : > { %1865 = vmatpush1.bf16.msra.mxu0 %v3099_v22 }
 0x42b   : > { %1866 = vmatprep.subr.bf16.mxu0 %v3100_v33 }
 0x42e   : > { %1867 = vmatpush1.bf16.msra.mxu0 %v3101_v27 }
 0x42f   : > { %1868 = vmatprep.subr.bf16.mxu0 %v4879_v28 }
 0x432   : > { %1869 = vmatpush1.bf16.msra.mxu0 %v4880_v23  ;;  %v2584_v23 = vld [vmem:[%s3876_s13 + $0x10] sm:$0xff] }
 0x433   : > { %1870 = vmatprep.subr.bf16.mxu0 %v4881_v29  ;;  %v1588_v29 = vunpack.c.l.bf16 %v2584_v23  ;;  %v1589_v16 = vunpack.c.h.bf16 %v2584_v23  ;;  %v3108_v23 = vld [vmem:[#allocation13 + $0xa0] ss:$24 sps:$4 sm:$0xff]  }
 0x436   : > { %1871 = vmatpush1.bf16.msra.mxu0 %v4882_v36 }
 0x48c   : > { %v1638_v25 = vpop.f32.mrb[12].mxu0  ;;  %v1679_v44 = vpop.f32.mrb[12].mxu1 }
 0x48d   : > { %v1640_v52 = vpop.f32.mrb[13].mxu0  ;;  %v1681_v3 = vpop.f32.mrb[13].mxu1  ;;  %v1727_v11 = vadd.f32 %v1638_v25, %v1584_v9  ;;  %v1741_v36 = vadd.f32 %v1679_v44, %v1588_v29  ;;  %v3110_v29 = vld [vmem:[#allocation13 + $0xd0] ss:$24 sps:$4 sm:$0xff]  }
 0x48e   : > { %v1642_v4 = vpop.f32.mrb[14].mxu0  ;;  %v1683_v5 = vpop.f32.mrb[14].mxu1  ;;  %v1728_v28 = vadd.f32 %v1640_v52, %v1585_v10  ;;  %v1742_v19 = vadd.f32 %v1681_v3, %v1589_v16  ;;  %v3111_v16 = vld [vmem:[#allocation13 + $0x104] ss:$24 sps:$4 sm:$0xff]  }
 0x48f   : > { %v1643_v6 = vpop.f32.mrb[15].mxu0  ;;  %v1684_v7 = vpop.f32.mrb[15].mxu1  ;;  %v2586_v12 = vmul.f32 -1.442695, %v1727_v11  ;;  %v2588_v20 = vmul.f32 -1.442695, %v1741_v36 }
 0x490   : > { %v2587_v15 = vmul.f32 -1.442695, %v1728_v28  ;;  %v2589_v24 = vmul.f32 -1.442695, %v1742_v19  ;;  %v3103_v11 = vld [vmem:[#allocation13 + $0x44] ss:$24 sps:$4 sm:$0xff]  }
 0x491   : > { %3002 = vpow2.f32 %v2586_v12  ;;  %v3105_v28 = vld [vmem:[#allocation13 + $0x74] ss:$24 sps:$4 sm:$0xff]   ;;  %v3107_v12 = vld [vmem:[#allocation13 + $0xa4] ss:$24 sps:$4 sm:$0xff]   ;;  %v3112_v36 = vld [vmem:[#allocation13 + $0x100] ss:$24 sps:$4 sm:$0xff]  }
 0x492   : > { %3004 = vpow2.f32 %v2587_v15  ;;  %v3109_v15 = vld [vmem:[#allocation13 + $0xd4] ss:$24 sps:$4 sm:$0xff]  }
 0x493   : > { %3006 = vpow2.f32 %v2588_v20  ;;  %v3113_v19 = vld [vmem:[#allocation13 + $0x134] ss:$24 sps:$4 sm:$0xff]   ;;  %v3114_v20 = vld [vmem:[#allocation13 + $0x130] ss:$24 sps:$4 sm:$0xff]  }
 0x494   : > { %3008 = vpow2.f32 %v2589_v24  ;;  %v3115_v24 = vld [vmem:[#allocation13 + $0x164] ss:$24 sps:$4 sm:$0xff]  }
 0x49b   : > { %v3003_v26 = vpop.eup %3002 }
 0x49c   : > { %v3005_v30 = vpop.eup %3004  ;;  %v1735_v59 = vadd.f32 1.0, %v3003_v26  ;;  %v3116_v26 = vld [vmem:[#allocation13 + $0x160] ss:$24 sps:$4 sm:$0xff]  }
 0x49d   : > { %v1736_v31 = vadd.f32 1.0, %v3005_v30  ;;  %v3007_v39 = vpop.eup %3006  ;;  %v3117_v30 = vld [vmem:[#allocation13 + $0x194] ss:$24 sps:$4 sm:$0xff]  }
 0x49e   : > { %3010 = vrcp.f32 %v1735_v59  ;;  %v3009_v61 = vpop.eup %3008  ;;  %v1749_v53 = vadd.f32 1.0, %v3007_v39  ;;  %v3118_v59 = vld [vmem:[#allocation13 + $0x190] ss:$24 sps:$4 sm:$0xff]   ;;  %v3120_v39 = vld [vmem:[#allocation13 + $0x1c0] ss:$24 sps:$4 sm:$0xff]  }
 0x49f   : > { %3012 = vrcp.f32 %v1736_v31  ;;  %v1750_v0 = vadd.f32 1.0, %v3009_v61  ;;  %v3119_v31 = vld [vmem:[#allocation13 + $0x1c4] ss:$24 sps:$4 sm:$0xff]   ;;  %v3121_v61 = vld [vmem:[#allocation13 + $0x1f4] ss:$24 sps:$4 sm:$0xff]  }
 0x4a0   : > { %3014 = vrcp.f32 %v1749_v53  ;;  %v3123_v53 = vld [vmem:[#allocation13 + $0x224] ss:$24 sps:$4 sm:$0xff]  }
 0x4a1   : > { %3016 = vrcp.f32 %v1750_v0  ;;  %v3124_v0 = vld [vmem:[#allocation13 + $0x220] ss:$24 sps:$4 sm:$0xff]  }
 0x4a8   : > { %v3011_v38 = vpop.eup %3010 }
 0x4a9   : > { %v3013_v58 = vpop.eup %3012 }
 0x4aa   : > { %v3015_v2 = vpop.eup %3014 }
 0x4ab   : > { %v3017_v32 = vpop.eup %3016  ;;  %v1763_v35 = vsub.f32 1.0, %v3015_v2  ;;  %v1767_v33 = vmul.f32 %v3015_v2, %v4426_v40 }
 0x4ac   : > { %v1764_v13 = vsub.f32 1.0, %v3017_v32  ;;  %v1768_v44 = vmul.f32 %v3017_v32, %v4430_v45  ;;  %v2590_v32 = vld [vmem:[%s3869_s4 + $0x18] sm:$0xff] }
 0x4cc   : > { %v1720_v18 = vpop.f32.mrb[16].mxu0 }
 0x4cd   : > { %v1755_v57 = vadd.f32 %v1720_v18, %v4883_v50  ;;  %v1722_v47 = vpop.f32.mrb[17].mxu0  ;;  %v3125_v18 = vld [vmem:[#allocation13 + $0x254] ss:$24 sps:$4 sm:$0xff]  }
 0x4ce   : > { %v1756_v51 = vadd.f32 %v1722_v47, %v4884_v55  ;;  %v1724_v54 = vpop.f32.mrb[18].mxu0  ;;  %v3128_v47 = vld [vmem:[#allocation13 + $0x280] ss:$24 sps:$4 sm:$0xff]  }
 0x4cf   : > { %v1757_v37 = vmul.f32 %v3011_v38, %v1755_v57  ;;  %v1725_v41 = vpop.f32.mrb[19].mxu0  ;;  %v3127_v57 = vld [vmem:[#allocation13 + $0x284] ss:$24 sps:$4 sm:$0xff]   ;;  %v3129_v38 = vld [vmem:[#allocation13 + $0x2b4] ss:$24 sps:$4 sm:$0xff]  }
 0x4d0   : > { %v1758_v34 = vmul.f32 %v3013_v58, %v1756_v51  ;;  %v3131_v51 = vld [vmem:[#allocation13 + $0x2e4] ss:$24 sps:$4 sm:$0xff]   ;;  %v3132_v54 = vld [vmem:[#allocation13 + $0x2e0] ss:$24 sps:$4 sm:$0xff]  }
 0x4d1   : > { %v1759_v42 = vadd.f32 %v1757_v37, %v1592_v21  ;;  %v3126_v21 = vld [vmem:[#allocation13 + $0x250] ss:$24 sps:$4 sm:$0xff]  }
 0x4d2   : > { %v1760_v49 = vadd.f32 %v1758_v34, %v1593_v60  ;;  %v3130_v60 = vld [vmem:[#allocation13 + $0x2b0] ss:$24 sps:$4 sm:$0xff]  }
 0x4d3   : > { %3018 = vtanh.f32 %v1759_v42 }
 0x4d4   : > { %3020 = vtanh.f32 %v1760_v49 }
 0x4dd   : > { %v3019_v1 = vpop.eup %3018 }
 0x4de   : > { %v3021_v22 = vpop.eup %3020  ;;  %v1765_v27 = vmul.f32 %v3019_v1, %v1763_v35  ;;  %v1779_v35 = vunpack.c.l.bf16 %v2590_v32  ;;  %v1780_v1 = vunpack.c.h.bf16 %v2590_v32  ;;  %v3138_v32 = vld [vmem:[#allocation15 + $0x10] sm:$0xff] (!%p2597_p5)  }
 0x4df   : > { %v1766_v25 = vmul.f32 %v3021_v22, %v1764_v13 }
 0x4e0   : > { %v1769_v52 = vadd.f32 %v1767_v33, %v1765_v27  ;;  %v2591_v27 = vld [vmem:[%s3876_s13 + $0x18] sm:$0xff] }
 0x4e1   : > { %v1770_v3 = vadd.f32 %v1768_v44, %v1766_v25  ;;  %v1783_v44 = vunpack.c.l.bf16 %v2591_v27 }
 0x4e2   : > { %v4497_v4 = vsel %vm1600_vm0, %v1769_v52, %v4426_v40  ;;  %v1773_v5 = vmax.f32 %v4436_v43, %v1769_v52  ;;  %v1784_v52 = vunpack.c.h.bf16 %v2591_v27  ;;  %v3150_v27 = vld [vmem:[#allocation16 + $0x8] sm:$0xff] (!%p2597_p5)  }
 0x4e3   : > { %v4501_v6 = vsel %vm1601_vm1, %v1770_v3, %v4430_v45  ;;  %v1774_v7 = vmax.f32 %v4439_v14, %v1770_v3  ;;  %v4514_v40 = vpack.c.bf16 %v4497_v4, %v4497_v4  ;;  %v3102_v45 = vld [vmem:[#allocation13 + $0x10] ss:$24 sps:$4 sm:$0xff]  }
 0x4e4   : > { %v1798_v8 = vpack.c.bf16 %v4501_v6, %v4501_v6  ;;  %v4507_v9 = vsel %vm1600_vm0, %v1773_v5, %v4436_v43  ;;  %v3104_v43 = vld [vmem:[#allocation13 + $0x40] ss:$24 sps:$4 sm:$0xff]  }
 0x4e5   : > { %v4510_v10 = vsel %vm1601_vm1, %v1774_v7, %v4439_v14  ;;  %v3106_v14 = vld [vmem:[#allocation13 + $0x70] ss:$24 sps:$4 sm:$0xff]  }
 0x4e6   : > { %1831 = vmatprep.mubr.bf16.mxu1 %v1798_v8  ;;  %1872 = vmatprep.mubr.bf16.mxu0 %v1798_v8 }
 0x4e7   : > { %1832 = vmatmul.mubr.bf16.vlgmr.msra.gmra.mrb[16].mxu1 %v4514_v40  ;;  %1873 = vmatmul.mubr.bf16.vlgmr.msra.gmra.mrb[20].mxu0 %v4514_v40 }
 0x4e8   : > { %1882 = vmatpush1.bf16.msra.mxu1 %v3102_v45  ;;  %1913 = vmatprep.mubr.bf16.mxu1 %v1798_v8 }
 0x4e9   : > { %1883 = vmatprep.subr.bf16.mxu1 %v3103_v11 }
 0x4ec   : > { %1884 = vmatpush1.bf16.msra.mxu1 %v3104_v43 }
 0x4ed   : > { %1885 = vmatprep.subr.bf16.mxu1 %v3105_v28 }
 0x4f0   : > { %1886 = vmatpush1.bf16.msra.mxu1 %v3106_v14 }
 0x4f1   : > { %1887 = vmatprep.subr.bf16.mxu1 %v3107_v12  ;;  %v2592_v12 = vld [vmem:[%s3882_s24 + $0x18] sm:$0xff] }
 0x4f4   : > { %1888 = vmatpush1.bf16.msra.mxu1 %v3108_v23 }
 0x4f5   : > { %1889 = vmatprep.subr.bf16.mxu1 %v3109_v15 }
 0x4f8   : > { %1890 = vmatpush1.bf16.msra.mxu1 %v3110_v29 }
 0x4f9   : > { %1891 = vmatprep.subr.bf16.mxu1 %v3111_v16  ;;  %v1787_v16 = vunpack.c.l.bf16 %v2592_v12 }
 0x4fc   : > { %1892 = vmatpush1.bf16.msra.mxu1 %v3112_v36 }
 0x4fd   : > { %1893 = vmatprep.subr.bf16.mxu1 %v3113_v19 }
 0x500   : > { %1894 = vmatpush1.bf16.msra.mxu1 %v3114_v20 }
 0x501   : > { %1895 = vmatprep.subr.bf16.mxu1 %v3115_v24  ;;  %v1788_v24 = vunpack.c.h.bf16 %v2592_v12  ;;  %v2598_v12 = vld [vmem:[%s4888_s14] ss:$0 sm:$0xff] (!%p2597_p5) }
 0x504   : > { %1896 = vmatpush1.bf16.msra.mxu1 %v3116_v26 }
 0x505   : > { %1897 = vmatprep.subr.bf16.mxu1 %v3117_v30 }
 0x508   : > { %1898 = vmatpush1.bf16.msra.mxu1 %v3118_v59 }
 0x509   : > { %1899 = vmatprep.subr.bf16.mxu1 %v3119_v31 }
 0x50c   : > { %1900 = vmatpush1.bf16.msra.mxu1 %v3120_v39 }
 0x50d   : > { %1901 = vmatprep.subr.bf16.mxu1 %v3121_v61 }
 0x510   : > { %1902 = vmatpush1.bf16.msra.mxu1 %v3122_v62 }
 0x511   : > { %1903 = vmatprep.subr.bf16.mxu1 %v3123_v53 }
 0x514   : > { %1904 = vmatpush1.bf16.msra.mxu1 %v3124_v0 }
 0x515   : > { %1905 = vmatprep.subr.bf16.mxu1 %v3125_v18 }
 0x518   : > { %1906 = vmatpush1.bf16.msra.mxu1 %v3126_v21 }
 0x519   : > { %1907 = vmatprep.subr.bf16.mxu1 %v3127_v57 }
 0x51c   : > { %1908 = vmatpush1.bf16.msra.mxu1 %v3128_v47 }
 0x51d   : > { %1909 = vmatprep.subr.bf16.mxu1 %v3129_v38 }
 0x520   : > { %1910 = vmatpush1.bf16.msra.mxu1 %v3130_v60 }
 0x521   : > { %1911 = vmatprep.subr.bf16.mxu1 %v3131_v51 }
 0x524   : > { %1912 = vmatpush1.bf16.msra.mxu1 %v3132_v54 }
 0x527   : > { %1914 = vmatmul.mubr.bf16.vlgmr.msra.gmra.mrb[20].mxu1 %v4514_v40 }
 0x5ba   : > { %v1833_v58 = vpop.f32.mrb[16].mxu1  ;;  %v1874_v37 = vpop.f32.mrb[20].mxu0 }
 0x5bb   : > { %v1835_v41 = vpop.f32.mrb[17].mxu1  ;;  %v1876_v34 = vpop.f32.mrb[21].mxu0  ;;  %v1922_v13 = vadd.f32 %v1833_v58, %v1779_v35  ;;  %v1936_v3 = vadd.f32 %v1874_v37, %v1783_v44  ;;  %v3140_v35 = vld [vmem:[#allocation15 + $0x18] sm:$0xff] (!%p2597_p5)   ;;  %v3145_v44 = vld [vmem:[#allocation15 + $0x70] sm:$0xff] (!%p2597_p5)  }
 0x5bc   : > { %v1837_v42 = vpop.f32.mrb[18].mxu1  ;;  %v1878_v49 = vpop.f32.mrb[22].mxu0  ;;  %v1923_v22 = vadd.f32 %v1835_v41, %v1780_v1  ;;  %v1937_v5 = vadd.f32 %v1876_v34, %v1784_v52  ;;  %v3141_v1 = vld [vmem:[#allocation15 + $0x60] sm:$0xff] (!%p2597_p5)   ;;  %v3151_v52 = vld [vmem:[#allocation16 + $0x10] sm:$0xff] (!%p2597_p5)  }
 0x5bd   : > { %v1838_v2 = vpop.f32.mrb[19].mxu1  ;;  %v1879_v56 = vpop.f32.mrb[23].mxu0  ;;  %v2593_v33 = vmul.f32 -1.442695, %v1922_v13  ;;  %v2595_v7 = vmul.f32 -1.442695, %v1936_v3 }
 0x5be   : > { %v2594_v25 = vmul.f32 -1.442695, %v1923_v22  ;;  %v2596_v8 = vmul.f32 -1.442695, %v1937_v5  ;;  %v3133_v42 = vld [vmem:[#allocation15 + $0x40] sm:$0xff] (!%p2597_p5)   ;;  %v3501_v2 = vmov (!%p2597_p5), 0.0  }
 0x5bf   : > { %3022 = vpow2.f32 %v2593_v33  ;;  %2665 = vmatprep.subr.bf16.mxu1 (!%p2597_p5), %v3501_v2  ;;  %2634 = vmatprep.subr.bf16.mxu0 (!%p2597_p5), %v3133_v42  ;;  %v3135_v56 = vld [vmem:[#allocation15 + $0x48] sm:$0xff] (!%p2597_p5)   ;;  %v3142_v13 = vld [vmem:[#allocation15 + $0x20] sm:$0xff] (!%p2597_p5)   ;;  %v3146_v3 = vld [vmem:[#allocation15 + $0x30] sm:$0xff] (!%p2597_p5)  }
 0x5c0   : > { %3024 = vpow2.f32 %v2594_v25  ;;  %v3143_v22 = vld [vmem:[#allocation15 + $0x68] sm:$0xff] (!%p2597_p5)   ;;  %v3149_v33 = vld [vmem:[#allocation16] sm:$0xff] (!%p2597_p5)   ;;  %v3147_v5 = vld [vmem:[#allocation15 + $0x78] sm:$0xff] (!%p2597_p5)   ;;  %2681 = vmatprep.mubr.msk.bf16.mxu1 (!%p2597_p5), %vm3502_vm8, %v3501_v2 }
 0x5c1   : > { %3026 = vpow2.f32 %v2595_v7  ;;  %2666 = vmatpush3.bf16.msra.mxu1 (!%p2597_p5), %v3149_v33  ;;  %v3144_v25 = vld [vmem:[#allocation15 + $0x28] sm:$0xff] (!%p2597_p5)   ;;  %v3152_v7 = vld [vmem:[#allocation16 + $0x18] sm:$0xff] (!%p2597_p5)  }
 0x5c2   : > { %3028 = vpow2.f32 %v2596_v8  ;;  %2667 = vmatprep.subr.bf16.mxu1 (!%p2597_p5), %v3501_v2  ;;  %v3148_v8 = vld [vmem:[#allocation15 + $0x38] sm:$0xff] (!%p2597_p5)  }
 0x5c5   : > { %2668 = vmatpush3.bf16.msra.mxu1 (!%p2597_p5), %v3150_v27 }
 0x5c6   : > { %2669 = vmatprep.subr.bf16.mxu1 (!%p2597_p5), %v3501_v2 }
 0x5c9   : > { %v3023_v40 = vpop.eup %3022  ;;  %2670 = vmatpush3.bf16.msra.mxu1 (!%p2597_p5), %v3151_v52 }
 0x5ca   : > { %v3025_v45 = vpop.eup %3024  ;;  %v1930_v11 = vadd.f32 1.0, %v3023_v40  ;;  %2671 = vmatprep.subr.bf16.mxu1 (!%p2597_p5), %v3501_v2 }
 0x5cb   : > { %v1931_v43 = vadd.f32 1.0, %v3025_v45  ;;  %v3027_v28 = vpop.eup %3026  ;;  %v3153_v45 = vld [vmem:[#allocation16 + $0x20] sm:$0xff] (!%p2597_p5)  }
 0x5cc   : > { %3030 = vrcp.f32 %v1930_v11  ;;  %v3029_v14 = vpop.eup %3028  ;;  %v1944_v23 = vadd.f32 1.0, %v3027_v28  ;;  %v3154_v11 = vld [vmem:[#allocation16 + $0x28] sm:$0xff] (!%p2597_p5)   ;;  %v3156_v28 = vld [vmem:[#allocation16 + $0x38] sm:$0xff] (!%p2597_p5)  }
 0x5cd   : > { %3032 = vrcp.f32 %v1931_v43  ;;  %v1945_v15 = vadd.f32 1.0, %v3029_v14  ;;  %2672 = vmatpush3.bf16.msra.mxu1 (!%p2597_p5), %v3152_v7  ;;  %v3155_v43 = vld [vmem:[#allocation16 + $0x30] sm:$0xff] (!%p2597_p5)  }
 0x5ce   : > { %3034 = vrcp.f32 %v1944_v23  ;;  %2673 = vmatprep.subr.bf16.mxu1 (!%p2597_p5), %v3501_v2 }
 0x5cf   : > { %3036 = vrcp.f32 %v1945_v15 }
 0x5d1   : > { %2674 = vmatpush3.bf16.msra.mxu1 (!%p2597_p5), %v3153_v45 }
 0x5d2   : > { %2675 = vmatprep.subr.bf16.mxu1 (!%p2597_p5), %v3501_v2 }
 0x5d5   : > { %2676 = vmatpush3.bf16.msra.mxu1 (!%p2597_p5), %v3154_v11 }
 0x5d6   : > { %v3031_v20 = vpop.eup %3030  ;;  %2677 = vmatprep.subr.bf16.mxu1 (!%p2597_p5), %v3501_v2 }
 0x5d7   : > { %v3033_v59 = vpop.eup %3032 }
 0x5d8   : > { %v3035_v0 = vpop.eup %3034 }
 0x5d9   : > { %v3037_v18 = vpop.eup %3036  ;;  %v1962_v38 = vmul.f32 %v3035_v0, %v4497_v4  ;;  %2678 = vmatpush3.bf16.msra.mxu1 (!%p2597_p5), %v3155_v43 }
 0x5da   : > { %v1959_v57 = vsub.f32 1.0, %v3037_v18  ;;  %v1963_v51 = vmul.f32 %v3037_v18, %v4501_v6  ;;  %2679 = vmatprep.subr.bf16.mxu1 (!%p2597_p5), %v3501_v2 }
 0x5dd   : > { %2680 = vmatpush3.bf16.msra.mxu1 (!%p2597_p5), %v3156_v28 }
 0x5fa   : > { %v1915_v29 = vpop.f32.mrb[20].mxu1 }
 0x5fb   : > { %v1950_v36 = vadd.f32 %v1915_v29, %v4883_v50  ;;  %v1917_v19 = vpop.f32.mrb[21].mxu1  ;;  %v1790_v50 = vstv %s1789_s21 }
 0x5fc   : > { %v1951_v26 = vadd.f32 %v1917_v19, %v4884_v55  ;;  %v1919_v30 = vpop.f32.mrb[22].mxu1  ;;  %vm1791_vm2 = vcmp.ge.s32.totalorder %v1790_v50, %v4885_v46  ;;  %vm1793_vm3 = vcmp.lt.s32.totalorder %v1790_v50, %v4886_v17  ;;  %v1958_v55 = vsub.f32 1.0, %v3035_v0 }
 0x5fd   : > { %v1952_v31 = vmul.f32 %v3031_v20, %v1950_v36  ;;  %v1920_v39 = vpop.f32.mrb[23].mxu1  ;;  %vm1792_vm4 = vcmp.ge.s32.totalorder %v1790_v50, %v4887_v48  ;;  %vm1794_vm5 = vcmp.lt.s32.totalorder %v1790_v50, %v4291_v63  ;;  %vm1795_vm6 = vmand %vm1791_vm2, %vm1793_vm3 }
 0x5fe   : > { %v1953_v61 = vmul.f32 %v3033_v59, %v1951_v26  ;;  %vm1796_vm7 = vmand %vm1792_vm4, %vm1794_vm5 }
 0x5ff   : > { %v1954_v62 = vadd.f32 %v1952_v31, %v1787_v16 }
 0x600   : > { %v1955_v53 = vadd.f32 %v1953_v61, %v1788_v24  ;;  %v2615_v24 = vld [vmem:[%s4889_s17] ss:$0 sm:$0xff] (!%p2597_p5) }
 0x601   : > { %3038 = vtanh.f32 %v1954_v62 }
 0x602   : > { %3040 = vtanh.f32 %v1955_v53 }
 0x60b   : > { %v3039_v21 = vpop.eup %3038 }
 0x60c   : > { %v3041_v47 = vpop.eup %3040  ;;  %v1960_v60 = vmul.f32 %v3039_v21, %v1958_v55 }
 0x60d   : > { %v1961_v54 = vmul.f32 %v3041_v47, %v1959_v57 }
 0x60e   : > { %v1964_v58 = vadd.f32 %v1962_v38, %v1960_v60  ;;  %1979 = sbr.rel (%p2597_p5) target bundleno = 2020 (0x7e4), region = 104 }
 0x60f   : > { %v1965_v46 = vadd.f32 %v1963_v51, %v1961_v54 }
 0x610   : > { %v1966_v17 = vsel %vm1795_vm6, %v1964_v58, %v4497_v4  ;;  %v1968_v37 = vmax.f32 %v4507_v9, %v1964_v58  ;;  %v3134_v4 = vld [vmem:[#allocation15] sm:$0xff] (!%p2597_p5)  }
 0x611   : > { %1972 = vst [vmem:[#allocation2] sm:$0xff] %v1966_v17  ;;  %v1967_v48 = vsel %vm1796_vm7, %v1965_v46, %v4501_v6  ;;  %v1969_v63 = vmax.f32 %v4510_v10, %v1965_v46  ;;  %2635 = vmatpush3.bf16.msra.mxu0 (!%p2597_p5), %v3134_v4  ;;  %v3136_v6 = vld [vmem:[#allocation15 + $0x8] sm:$0xff] (!%p2597_p5)  }
 0x612   : > { %v1970_v41 = vsel %vm1795_vm6, %v1968_v37, %v4507_v9  ;;  %1973 = vst [vmem:[#allocation2 + $0x8] sm:$0xff] %v1967_v48  ;;  %2636 = vmatprep.subr.bf16.mxu0 (!%p2597_p5), %v3135_v56  ;;  %v3137_v9 = vld [vmem:[#allocation15 + $0x50] sm:$0xff] (!%p2597_p5)  }
 0x613   : > { %1974 = vst [vmem:[#allocation3] sm:$0xff] %v1970_v41  ;;  %v1971_v34 = vsel %vm1796_vm7, %v1969_v63, %v4510_v10  ;;  %v3139_v10 = vld [vmem:[#allocation15 + $0x58] sm:$0xff] (!%p2597_p5)   ;;  %v1980_v40 = vpack.c.bf16 (!%p2597_p5), %v1970_v41, %v1970_v41 }
 0x614   : > { %1975 = vst [vmem:[#allocation3 + $0x8] sm:$0xff] %v1971_v34  ;;  %v1981_v49 = vpack.c.bf16 (!%p2597_p5), %v1971_v34, %v1971_v34 }
 0x615   : > { %2637 = vmatpush3.bf16.msra.mxu0 %v3136_v6 }
 0x616   : > { %2149 = vmatprep.mubr.bf16.mxu0 %v1981_v49  ;;  %2638 = vmatprep.subr.bf16.mxu0 %v3137_v9 }
 0x619   : > { %2639 = vmatpush3.bf16.msra.mxu0 %v3138_v32 }
 0x61a   : > { %2640 = vmatprep.subr.bf16.mxu0 %v3139_v10 }
 0x61d   : > { %2641 = vmatpush3.bf16.msra.mxu0 %v3140_v35 }
 0x61e   : > { %2642 = vmatprep.subr.bf16.mxu0 %v3141_v1 }
 0x621   : > { %2643 = vmatpush3.bf16.msra.mxu0 %v3142_v13 }
 0x622   : > { %2644 = vmatprep.subr.bf16.mxu0 %v3143_v22 }
 0x625   : > { %2645 = vmatpush3.bf16.msra.mxu0 %v3144_v25 }
 0x626   : > { %2646 = vmatprep.subr.bf16.mxu0 %v3145_v44 }
 0x629   : > { %2647 = vmatpush3.bf16.msra.mxu0 %v3146_v3 }
 0x62a   : > { %2648 = vmatprep.subr.bf16.mxu0 %v3147_v5 }
 0x62d   : > { %2649 = vmatpush3.bf16.msra.mxu0 %v3148_v8 }
 0x630   : > { %2150 = vmatmul.mubr.bf16.vlgmr.msra.gmra.mrb[0].mxu0 %v1980_v40 }
 0x703   : > { %v2650_v14 = vpop.f32.mrb[0].mxu0 }
 0x704   : > { %v2651_v23 = vpop.f32.mrb[1].mxu0 }
 0x705   : > { %v2652_v15 = vadd.f32 %v2651_v23, %v2650_v14  ;;  %v2653_v29 = vpop.f32.mrb[2].mxu0 }
 0x706   : > { %v2654_v16 = vpop.f32.mrb[3].mxu0 }
 0x707   : > { %v2152_v36 = vadd.f32 %v2652_v15, %v2598_v12 }
 0x709   : > { %v2157_v19 = vmax.f32 %v2152_v36, 0.0 }
 0x70b   : > { %v2158_v20 = vpack.c.bf16 %v2157_v19, %v2157_v19 }
 0x70d   : > { %2682 = vmatmul.mubr.bf16.vlgmr.msra.gmra.mrb[0].mxu1 %v2158_v20 }
 0x7e0   : > { %v2264_v26 = vpop.f32.mrb[0].mxu1 }
 0x7e1   : > { %v2265_v30 = vadd.f32 %v2615_v24, %v2264_v26  ;;  %v2683_v59 = vpop.f32.mrb[1].mxu1 }
 0x7e2   : > { %v2267_v31 = vpop.f32.mrb[2].mxu1 }
 0x7e3   : > { %2270 = vst [vmem:[#allocation18] sm:$0xff] %v2265_v30  ;;  %v2684_v39 = vpop.f32.mrb[3].mxu1 }
 0x7e4 PF: > { %p2752_p8 = scmp.eq.s32.totalorder %s3595_s23, 1  ;;  %s3503_s6 = smov [#allocation18]  }
 0x7e5   : > { %s2280_s12 = sshll.u32 %s3503_s6, 4  ;;  %s2281_s12 = int_to_ptr.vmem [resolvable:$true] %s2280_s12 }
 0x7e6   : > { %s3387_s26 = scalar_lea.vmem %s2281_s12, 128  ;;  %p3394_p4 = scmp.lt.s32.totalorder %s2281_s12, %s2281_s12 }
 0x7e7   : > { %p3388_p3 = scmp.ne.s32.totalorder %s2281_s12, %s3387_s26  ;;  %p3395_p10 = scmp.lt.s32.totalorder %s3387_s26, %s3387_s26 }
 0x7e9   : > { %p3389_p12 = pnand %p3388_p3, %p2752_p8  ;;  %p3396_p0 = por %p3395_p10, %p3394_p4 }
 0x7eb   : > { %p3390_p13 = pneg %p3389_p12 }
 0x7ed   : > { %p3397_p2 = pnand %p3396_p0, %p3390_p13 }
 0x7ef   : > { %3400 = shalt.err (!%p3397_p2)
}
 0x7f0   : > { %s4890_s11 = sld [smem:[#allocation96_spill]] }
 0x7f6   : > { %s3401_s20 = scalar_lea.hbm %s4890_s11, 128 }
 0x7f7   : > { %p3402_p6 = scmp.ne.s32.totalorder %s4890_s11, %s3401_s20  ;;  %p3407_p7 = scmp.lt.u32.totalorder %s3401_s20, %s4890_s11 }
 0x7f9   : > { %p3403_p9 = pnand %p3402_p6, %p2752_p8 }
 0x7fb   : > { %p3404_p1 = pneg %p3403_p9 }
 0x7fd   : > { %p3409_p11 = pnand %p3407_p7, %p3404_p1 }
 0x7ff   : > { %3412 = shalt.err (!%p3409_p11)
}
 0x800   : > { %2712 = dma.vmem_to_hbm [thread:$0]  (%p2752_p8), %s2281_s12, 128, %s4890_s11, [#allocation6]  }
 0x801   : > { %3458 = dma.done.wait (%p2752_p8), [#allocation6], 128  }
 0x802   : > { %3460 = vsyncadd (%p2752_p8), [#allocation6], 4294967168 }
 0x803 PF: > { %s4891_s10 = sld [smem:[#allocation27_spill]]  ;;  %s4892_s28 = sld [smem:[#allocation29_spill]] }
 0x804   : > { %s4893_s20 = sld [smem:[#allocation26_spill]]  ;;  %s4894_s21 = sld [smem:[#allocation28_spill]] }
 0x805   : > { %s4895_s17 = smov %s3467_s18  ;;  %s4896_s18 = smov %s3471_s19 }
 0x809   : > { %s31_s22 = sadd.s32 1, %s4891_s10   ;;  %s4897_s19 = smov %s4892_s28 }
 0x80a   : > { %p28_p5 = scmp.ge.s32.totalorder %s31_s22, 4  }
 0x80c   :  { %30 = sbr.rel (!%p28_p5) target bundleno = 19 (0x13), region = 165 }
 0x813   :  { %2293 = vsyncpa [#allocation5], 1 }
 0x814   :  { %2295 = vsyncpa [#allocation5 + $0x1], 1 }
 0x815   :  { %2296 = vsyncpa [#allocation8], 1 }
 0x816   :  { %2298 = vsyncpa [#allocation8 + $0x1], 1 }
 0x817   :  { %2299 = vsyncpa [#allocation11], 1 }
 0x818   :  { %2300 = vsyncpa [#allocation14], 1 }
 0x819   :  { %2301 = vsyncpa [#allocation17], 1 }
 0x81a   :  { %2302 = vsyncpa [#allocation6], 1 }
 0x81b   :  { %2304 = vsyncpa [#allocation6 + $0x1], 1 }

</bundles_post_ra>
